<compile_context>
chip_gen: v6e
topology: v6e:2x2x1
jax: 0.10.0
libtpu: 0.0.40
codegen_flags: <defaults>
</compile_context>

<pallas_src>
import functools

import jax
import jax.numpy as jnp
import numpy as np
from jax.experimental import pallas as pl
from jax.experimental.pallas import tpu as pltpu

BN_EPS = 1e-5
LANE = 128


def _round_up(x, m):
    return ((x + m - 1) // m) * m


@functools.lru_cache(maxsize=None)
def _hw_config():
    """Per-generation VMEM limit / tile sizes (v5e,v6e: 128 MiB; v7x: 64 MiB)."""
    try:
        cap = int(pltpu.get_tpu_info().vmem_capacity_bytes)
    except Exception:
        cap = 64 * 1024 * 1024
    if cap >= 100 * 1024 * 1024:            # v5e / v6e
        return {"vmem_limit": 100 * 1024 * 1024, "mm_tile": 1024, "ew_tile": 2048}
    return {"vmem_limit": 48 * 1024 * 1024, "mm_tile": 512, "ew_tile": 1024}


def _cparams():
    return pltpu.CompilerParams(dimension_semantics=("parallel",),
                                vmem_limit_bytes=_hw_config()["vmem_limit"])


# ---------------------------------------------------------------------------
# Kernel 1: tiled (TILE_M, K) @ (K, Cp) matmul + per-tile BN partial stats
# (used for the strided / small-Cin conv1 im2col path and the 1x1 shortcut)
# ---------------------------------------------------------------------------
def _matmul_stats_kernel(p_ref, w_ref, y_ref, sum_ref, ssq_ref):
    acc = jnp.dot(p_ref[...], w_ref[...], preferred_element_type=jnp.float32)
    y_ref[...] = acc.astype(y_ref.dtype)                 # bf16 store (rev 3)
    sum_ref[0] = jnp.sum(acc, axis=0, keepdims=True)     # (1, Cp) row store
    ssq_ref[0] = jnp.sum(acc * acc, axis=0, keepdims=True)


def matmul_bn_stats(patches, w_mat, *, tile_m=None):
    """patches (M, K) bf16 @ w_mat (K, Cp) bf16 ->
       (conv_out (M, Cp) bf16, channel_sum (Cp,) f32, channel_sumsq (Cp,) f32)."""
    M, K = patches.shape
    Cp = w_mat.shape[1]
    tm = min(tile_m or _hw_config()["mm_tile"], _round_up(M, 8))
    Mp = _round_up(M, tm)
    if Mp != M:  # zero rows contribute 0 to the stats; sliced off below
        patches = jnp.pad(patches, ((0, Mp - M), (0, 0)))
    n_tiles = Mp // tm

    cost = pl.CostEstimate(
        flops=2 * Mp * K * Cp + 4 * Mp * Cp,
        transcendentals=0,
        bytes_accessed=Mp * K * 2 + K * Cp * 2 + Mp * Cp * 2
                       + 2 * n_tiles * Cp * 4)

    y, ps, pq = pl.pallas_call(
        _matmul_stats_kernel,
        out_shape=(jax.ShapeDtypeStruct((Mp, Cp), jnp.bfloat16),
                   jax.ShapeDtypeStruct((n_tiles, 1, Cp), jnp.float32),
                   jax.ShapeDtypeStruct((n_tiles, 1, Cp), jnp.float32)),
        grid=(n_tiles,),
        in_specs=[pl.BlockSpec((tm, K), lambda i: (i, 0)),
                  pl.BlockSpec((K, Cp), lambda i: (0, 0))],   # pinned weights
        out_specs=(pl.BlockSpec((tm, Cp), lambda i: (i, 0)),
                   pl.BlockSpec((1, 1, Cp), lambda i: (i, 0, 0)),
                   pl.BlockSpec((1, 1, Cp), lambda i: (i, 0, 0))),
        compiler_params=_cparams(),
        cost_estimate=cost,
    )(patches, w_mat)
    return y[:M], jnp.sum(ps[:, 0, :], axis=0), jnp.sum(pq[:, 0, :], axis=0)


# ---------------------------------------------------------------------------
# Kernel 2: direct 3x3 / stride-1 conv (per image) + per-image BN stats.
# The halo is built inside the kernel (zeroed VMEM scratch, interior written
# from the loaded block), optionally fusing the previous BN scale/shift + ReLU
# onto the loaded window.  The 9 taps are accumulated as shifted-window
# matmuls, so the input is read from HBM exactly once.
# ---------------------------------------------------------------------------
def _conv3x3_s1_kernel(*refs, pre_bn):
    if pre_bn:
        x_ref, sc_ref, sh_ref, w_ref, y_ref, sum_ref, ssq_ref, pad_ref = refs
    else:
        x_ref, w_ref, y_ref, sum_ref, ssq_ref, pad_ref = refs
    H, W, Ci = x_ref.shape[1], x_ref.shape[2], x_ref.shape[3]
    Co = w_ref.shape[2]

    # In-kernel halo: zero the padded scratch, then write the (optionally
    # BN+ReLU-transformed) image into its interior.  No HBM-side jnp.pad.
    pad_ref[...] = jnp.zeros(pad_ref.shape, pad_ref.dtype)
    x = x_ref[0]
    if pre_bn:
        sc = sc_ref[...].reshape(1, 1, Ci)
        sh = sh_ref[...].reshape(1, 1, Ci)
        x = jnp.maximum(x.astype(jnp.float32) * sc + sh, 0.0)
    pad_ref[1:H + 1, 1:W + 1, :] = x.astype(pad_ref.dtype)

    # TODO(synk): layout-preserving tap access / kw-packed contraction would
    # remove the per-tap sublane-shift copies and deepen K on v6e/v7x.
    acc = jnp.zeros((H * W, Co), jnp.float32)
    for kh in range(3):
        for kw in range(3):
            win = pad_ref[kh:kh + H, kw:kw + W, :].reshape(H * W, Ci)
            acc = acc + jnp.dot(win, w_ref[kh * 3 + kw],
                                preferred_element_type=jnp.float32)
    y_ref[0] = acc.astype(y_ref.dtype)                    # bf16 store (rev 3)
    sum_ref[0] = jnp.sum(acc, axis=0, keepdims=True)
    ssq_ref[0] = jnp.sum(acc * acc, axis=0, keepdims=True)


def conv3x3_s1_bn_stats(x_nhwc, w_taps, *, pre_scale=None, pre_shift=None):
    """x (N,H,W,Ci) bf16 (Ci multiple of 128), w_taps (9,Ci,Co) bf16.
    If pre_scale/pre_shift (1,Ci) f32 are given, the kernel applies
    relu(x*scale+shift) to the loaded window before convolving (fused bn1).
    Returns (conv_out (N*H*W, Co) bf16, channel_sum (Co,), channel_sumsq (Co,))."""
    N, H, W, Ci = x_nhwc.shape
    Co = w_taps.shape[-1]
    assert Ci % LANE == 0 and w_taps.shape == (9, Ci, Co)
    pre_bn = pre_scale is not None
    Hp, Wp = H + 2, W + 2

    args = [x_nhwc]
    in_specs = [pl.BlockSpec((1, H, W, Ci), lambda n: (n, 0, 0, 0))]
    if pre_bn:
        args += [pre_scale, pre_shift]
        in_specs += [pl.BlockSpec((1, Ci), lambda n: (0, 0)),
                     pl.BlockSpec((1, Ci), lambda n: (0, 0))]
    args.append(w_taps)
    in_specs.append(pl.BlockSpec((9, Ci, Co), lambda n: (0, 0, 0)))   # pinned

    cost = pl.CostEstimate(
        flops=2 * N * H * W * 9 * Ci * Co,
        transcendentals=0,
        bytes_accessed=N * H * W * Ci * 2 + 9 * Ci * Co * 2
                       + N * H * W * Co * 2 + 2 * N * Co * 4)

    # TODO(synk): row-strip the grid ((N, ceil(H/TILE_H)) with a manually DMA'd
    # haloed strip) so very large images stay in VMEM and both v7x cores are
    # busy at N=1.
    y, ps, pq = pl.pallas_call(
        functools.partial(_conv3x3_s1_kernel, pre_bn=pre_bn),
        out_shape=(jax.ShapeDtypeStruct((N, H * W, Co), jnp.bfloat16),
                   jax.ShapeDtypeStruct((N, 1, Co), jnp.float32),
                   jax.ShapeDtypeStruct((N, 1, Co), jnp.float32)),
        grid=(N,),
        in_specs=in_specs,
        out_specs=(pl.BlockSpec((1, H * W, Co), lambda n: (n, 0, 0)),
                   pl.BlockSpec((1, 1, Co), lambda n: (n, 0, 0)),
                   pl.BlockSpec((1, 1, Co), lambda n: (n, 0, 0))),
        scratch_shapes=[pltpu.VMEM((Hp, Wp, Ci), jnp.bfloat16)],
        compiler_params=_cparams(),
        cost_estimate=cost,
    )(*args)
    return (y.reshape(N * H * W, Co),
            jnp.sum(ps[:, 0, :], axis=0), jnp.sum(pq[:, 0, :], axis=0))


# ---------------------------------------------------------------------------
# Kernel 3: fused final pass: bn2-apply + residual (+ its folded BN) + ReLU
# ---------------------------------------------------------------------------
def _bn_residual_kernel(*refs, residual_bn, apply_relu):
    if residual_bn:
        y_ref, sc_ref, sh_ref, r_ref, rsc_ref, rsh_ref, o_ref = refs
    else:
        y_ref, sc_ref, sh_ref, r_ref, o_ref = refs
    out = y_ref[...].astype(jnp.float32) * sc_ref[...] + sh_ref[...]
    r = r_ref[...].astype(jnp.float32)
    if residual_bn:
        out = out + (r * rsc_ref[...] + rsh_ref[...])
    else:
        out = out + r                          # identity shortcut: no BN FMA
    if apply_relu:
        out = jnp.maximum(out, 0.0)
    o_ref[...] = out.astype(o_ref.dtype)


def bn_apply_residual(y, scale, shift, res, rscale=None, rshift=None, *,
                      apply_relu=True, out_dtype=jnp.float32, tile_m=None):
    M, Cp = y.shape
    residual_bn = rscale is not None
    tm = min(tile_m or _hw_config()["ew_tile"], _round_up(M, 8))
    Mp = _round_up(M, tm)
    n_tiles = Mp // tm
    if Mp != M:
        y = jnp.pad(y, ((0, Mp - M), (0, 0)))
        res = jnp.pad(res, ((0, Mp - M), (0, 0)))

    row_spec = pl.BlockSpec((tm, Cp), lambda i: (i, 0))
    vec_spec = pl.BlockSpec((1, Cp), lambda i: (0, 0))       # pinned vectors
    if residual_bn:
        args = [y, scale, shift, res, rscale, rshift]
        in_specs = [row_spec, vec_spec, vec_spec, row_spec, vec_spec, vec_spec]
    else:
        args = [y, scale, shift, res]
        in_specs = [row_spec, vec_spec, vec_spec, row_spec]

    bytes_acc = (y.size * y.dtype.itemsize + res.size * res.dtype.itemsize
                 + Cp * 4 * (4 if residual_bn else 2)
                 + Mp * Cp * np.dtype(out_dtype).itemsize)

    out = pl.pallas_call(
        functools.partial(_bn_residual_kernel, residual_bn=residual_bn,
                          apply_relu=apply_relu),
        out_shape=jax.ShapeDtypeStruct((Mp, Cp), out_dtype),
        grid=(n_tiles,),
        in_specs=in_specs,
        out_specs=row_spec,
        compiler_params=_cparams(),
        cost_estimate=pl.CostEstimate(flops=7 * Mp * Cp, transcendentals=0,
                                      bytes_accessed=int(bytes_acc)),
    )(*args)
    return out[:M]


# ---------------------------------------------------------------------------
# Plain-JAX glue (tiny per-channel work)
# ---------------------------------------------------------------------------
def bn_fold(chan_sum, chan_ssq, count, gamma, beta, cp, eps=BN_EPS):
    """Fold batch statistics + affine params into per-channel scale/shift."""
    # NOTE: E[x^2]-E[x]^2 variance; fine at the stated tolerance (see review).
    mean = chan_sum / count
    var = jnp.maximum(chan_ssq / count - mean * mean, 0.0)
    c = gamma.shape[0]
    g = jnp.zeros((cp,), jnp.float32).at[:c].set(gamma.astype(jnp.float32))
    b = jnp.zeros((cp,), jnp.float32).at[:c].set(beta.astype(jnp.float32))
    scale = g * jax.lax.rsqrt(var + eps)
    shift = b - mean * scale
    return scale.reshape(1, cp), shift.reshape(1, cp)


def im2col(x, ksize, stride, padding):
    """x: (N,H,W,C) -> ((N*Ho*Wo, ksize*ksize*C), (N, Ho, Wo))."""
    N, H, W, C = x.shape
    xp = jnp.pad(x, ((0, 0), (padding, padding), (padding, padding), (0, 0)))
    Ho = (H + 2 * padding - ksize) // stride + 1
    Wo = (W + 2 * padding - ksize) // stride + 1
    cols = []
    for kh in range(ksize):
        for kw in range(ksize):
            cols.append(xp[:, kh:kh + stride * Ho:stride,
                           kw:kw + stride * Wo:stride, :])
    p = jnp.concatenate(cols, axis=-1)
    return p.reshape(N * Ho * Wo, ksize * ksize * C), (N, Ho, Wo)


def pack_weight_matmul(w_oihw, cout_pad):
    """(Co,Ci,kh,kw) -> (kh*kw*Ci, cout_pad) bf16 matching im2col column order."""
    Co, Ci, KH, KW = w_oihw.shape
    w = jnp.transpose(w_oihw, (2, 3, 1, 0)).reshape(KH * KW * Ci, Co)
    w = jnp.pad(w, ((0, 0), (0, cout_pad - Co)))
    return w.astype(jnp.bfloat16)


def pack_weight_taps(w_oihw, cin_pad, cout_pad):
    """(Co,Ci,3,3) -> (9, cin_pad, cout_pad) bf16 for the direct 3x3 kernel."""
    Co, Ci, KH, KW = w_oihw.shape
    w = jnp.transpose(w_oihw, (2, 3, 1, 0))                       # (3,3,Ci,Co)
    w = jnp.pad(w, ((0, 0), (0, 0), (0, cin_pad - Ci), (0, cout_pad - Co)))
    return w.reshape(KH * KW, cin_pad, cout_pad).astype(jnp.bfloat16)


# ---------------------------------------------------------------------------
# BasicBlock forward
# ---------------------------------------------------------------------------
def basic_block_forward(x_nchw, params, stride):
    x = jnp.transpose(x_nchw, (0, 2, 3, 1)).astype(jnp.bfloat16)  # NCHW->NHWC
    N, H, W, Cin = x.shape
    Cout = params["conv1_w"].shape[0]
    Cp = _round_up(Cout, LANE)

    # ---- conv1 (raw output, bf16) + bn1 batch statistics -----------------
    if stride == 1 and Cin % LANE == 0:
        # Direct 9-tap kernel: input read from HBM once, lane-dense channels.
        w1 = pack_weight_taps(params["conv1_w"], Cin, Cp)
        y1, s1, q1 = conv3x3_s1_bn_stats(x, w1)
        Ho, Wo = H, W
    else:
        # Strided or small-Cin conv1: im2col matmul (K = 9*Cin keeps MXU fed).
        # TODO(synk): a direct strided 3x3 kernel (even/odd row phases) would
        # cut the ~2.25x im2col input traffic of downsampling blocks to ~1x.
        w1 = pack_weight_matmul(params["conv1_w"], Cp)
        p1, (_, Ho, Wo) = im2col(x, 3, stride, 1)
        y1, s1, q1 = matmul_bn_stats(p1, w1)
    M = N * Ho * Wo
    sc1, sh1 = bn_fold(s1, q1, M, params["bn1_g"], params["bn1_b"], Cp)

    # ---- conv2 with bn1-apply + ReLU fused into the 9-tap kernel ---------
    # (no h1 intermediate in HBM; halo built in VMEM keeps padding at 0)
    w2 = pack_weight_taps(params["conv2_w"], Cp, Cp)
    y2, s2, q2 = conv3x3_s1_bn_stats(y1.reshape(N, Ho, Wo, Cp), w2,
                                     pre_scale=sc1, pre_shift=sh1)
    sc2, sh2 = bn_fold(s2, q2, M, params["bn2_g"], params["bn2_b"], Cp)

    # ---- shortcut ----------------------------------------------------------
    if stride != 1 or Cin != Cout:
        ws = pack_weight_matmul(params["convs_w"], Cp)            # (Cin, Cp)
        xs = x[:, ::stride, ::stride, :].reshape(M, Cin)
        res, ss, qs = matmul_bn_stats(xs, ws)                     # bf16
        rsc, rsh = bn_fold(ss, qs, M, params["bns_g"], params["bns_b"], Cp)
    else:
        # Identity shortcut: keep bf16, skip the per-channel FMA in the kernel.
        res = jnp.pad(x, ((0, 0), (0, 0), (0, 0), (0, Cp - Cin))).reshape(M, Cp)
        rsc = rsh = None

    # ---- bn2-apply + shortcut(+BN) add + ReLU (single fused pass) --------
    out = bn_apply_residual(y2, sc2, sh2, res, rsc, rsh,
                            apply_relu=True, out_dtype=jnp.float32)
    out = out.reshape(N, Ho, Wo, Cp)[..., :Cout]
    return jnp.transpose(out, (0, 3, 1, 2))                      # NHWC->NCHW


# ---------------------------------------------------------------------------
# Pure-JAX reference (mirrors the PyTorch forward, training-mode BN, f32)
# ---------------------------------------------------------------------------
def reference_forward(x, params, stride):
    def conv(x, w, s, p):
        return jax.lax.conv_general_dilated(
            x, w, (s, s), [(p, p), (p, p)],
            dimension_numbers=("NCHW", "OIHW", "NCHW"),
            precision=jax.lax.Precision.HIGHEST)

    def bn(x, g, b):
        mean = jnp.mean(x, axis=(0, 2, 3), keepdims=True)
        var = jnp.mean(jnp.square(x - mean), axis=(0, 2, 3), keepdims=True)
        xn = (x - mean) * jax.lax.rsqrt(var + BN_EPS)
        return xn * g[None, :, None, None] + b[None, :, None, None]

    out = jax.nn.relu(bn(conv(x, params["conv1_w"], stride, 1),
                         params["bn1_g"], params["bn1_b"]))
    out = bn(conv(out, params["conv2_w"], 1, 1),
             params["bn2_g"], params["bn2_b"])
    cin, cout = x.shape[1], params["conv1_w"].shape[0]
    if stride != 1 or cin != cout:
        sc = bn(conv(x, params["convs_w"], stride, 0),
                params["bns_g"], params["bns_b"])
    else:
        sc = x
    return jax.nn.relu(out + sc)


def init_params(key, in_channels, out_channels, stride):
    ks = jax.random.split(key, 8)
    p = {
        "conv1_w": 0.1 * jax.random.normal(
            ks[0], (out_channels, in_channels, 3, 3), jnp.float32),
        "bn1_g": 1.0 + 0.1 * jax.random.normal(ks[1], (out_channels,), jnp.float32),
        "bn1_b": 0.1 * jax.random.normal(ks[2], (out_channels,), jnp.float32),
        "conv2_w": 0.1 * jax.random.normal(
            ks[3], (out_channels, out_channels, 3, 3), jnp.float32),
        "bn2_g": 1.0 + 0.1 * jax.random.normal(ks[4], (out_channels,), jnp.float32),
        "bn2_b": 0.1 * jax.random.normal(ks[5], (out_channels,), jnp.float32),
    }
    if stride != 1 or in_channels != out_channels:
        p["convs_w"] = 0.1 * jax.random.normal(
            ks[6], (out_channels, in_channels, 1, 1), jnp.float32)
        p["bns_g"] = 1.0 + 0.05 * jax.random.normal(ks[7], (out_channels,), jnp.float32)
        p["bns_b"] = jnp.zeros((out_channels,), jnp.float32)
    return p


if __name__ == "__main__":
    key = jax.random.PRNGKey(0)
    # (in_channels, out_channels, stride, spatial): exercises both the
    # projection-shortcut / strided-conv1 path and the identity-shortcut path.
    configs = [(4, 8, 2, 16), (8, 8, 1, 16)]
    for cin, cout, stride, hw in configs:
        key, k_x, k_p = jax.random.split(key, 3)
        x = jax.random.normal(k_x, (2, cin, hw, hw), jnp.float32)    # NCHW
        params = init_params(k_p, cin, cout, stride)

        fwd = jax.jit(functools.partial(basic_block_forward, stride=stride))
        out = jax.block_until_ready(fwd(x, params))

        ref = reference_forward(x, params, stride)
        # Tolerance reflects bf16 MXU matmuls and bf16 conv intermediates vs
        # the f32 reference (accepted accuracy trade per the perf review).
        np.testing.assert_allclose(np.asarray(out), np.asarray(ref),
                                   rtol=3e-2, atol=3e-2)
        assert out.shape == ref.shape

    print("KERNEL_OK")
</pallas_src>

<mosaic_0001>
module attributes {stable_mosaic.version = 11 : i64} {
  func.func @_matmul_stats_kernel(%arg0: i32, %arg1: memref<128x36xbf16, #tpu.memory_space<vmem>>, %arg2: memref<36x128xbf16, #tpu.memory_space<vmem>>, %arg3: memref<128x128xbf16, #tpu.memory_space<vmem>>, %arg4: memref<1x1x128xf32, #tpu.memory_space<vmem>>, %arg5: memref<1x1x128xf32, #tpu.memory_space<vmem>>) attributes {dimension_semantics = [#tpu.dimension_semantics<parallel>], iteration_bounds = array<i64: 1>, scalar_prefetch = 0 : i64, scratch_operands = 0 : i64, tpu.core_type = #tpu.core_type<tc>, window_params = [{transform_indices = @transform_0, window_bounds = array<i64: 128, 36>}, {pipeline_mode = #tpu.pipeline_mode<synchronous>, transform_indices = @transform_1, window_bounds = array<i64: 36, 128>}, {transform_indices = @transform_2, window_bounds = array<i64: 128, 128>}, {transform_indices = @transform_3, window_bounds = array<i64: 1, 1, 128>}, {transform_indices = @transform_4, window_bounds = array<i64: 1, 1, 128>}]} {
    %c0 = arith.constant 0 : index
    %c0_0 = arith.constant 0 : index
    %0 = vector.load %arg1[%c0, %c0_0] : memref<128x36xbf16, #tpu.memory_space<vmem>>, vector<128x36xbf16>
    %c0_1 = arith.constant 0 : index
    %c0_2 = arith.constant 0 : index
    %1 = vector.load %arg2[%c0_1, %c0_2] : memref<36x128xbf16, #tpu.memory_space<vmem>>, vector<36x128xbf16>
    %cst = arith.constant dense<0.000000e+00> : vector<128x128xf32>
    %2 = tpu.matmul %0, %1, %cst {dimension_numbers = #tpu.dot_dimension_numbers<[1], [0], [0], [1], [0, 0, 1, 1], [], []>} : vector<128x36xbf16>, vector<36x128xbf16>, vector<128x128xf32> -> vector<128x128xf32>
    %3 = arith.truncf %2 : vector<128x128xf32> to vector<128x128xbf16>
    %c0_3 = arith.constant 0 : index
    %c0_4 = arith.constant 0 : index
    %4 = vector.load %arg3[%c0_3, %c0_4] : memref<128x128xbf16, #tpu.memory_space<vmem>>, vector<128x128xbf16>
    tpu.vector_store %arg3[%c0_3, %c0_4], %3 {strides = array<i32>} : memref<128x128xbf16, #tpu.memory_space<vmem>>, vector<128x128xbf16>,
    %cst_5 = arith.constant dense<0.000000e+00> : vector<128xf32>
    %5 = vector.multi_reduction <add>, %2, %cst_5 [0] : vector<128x128xf32> to vector<128xf32>
    %6 = vector.shape_cast %5 : vector<128xf32> to vector<1x128xf32>
    %c0_6 = arith.constant 0 : index
    %c0_7 = arith.constant 0 : index
    %c0_8 = arith.constant 0 : index
    %7 = vector.load %arg4[%c0_6, %c0_7, %c0_8] : memref<1x1x128xf32, #tpu.memory_space<vmem>>, vector<1x1x128xf32>
    %8 = vector.shape_cast %7 : vector<1x1x128xf32> to vector<1x128xf32>
    %9 = vector.shape_cast %6 : vector<1x128xf32> to vector<1x1x128xf32>
    tpu.vector_store %arg4[%c0_6, %c0_7, %c0_8], %9 {strides = array<i32>} : memref<1x1x128xf32, #tpu.memory_space<vmem>>, vector<1x1x128xf32>,
    %10 = arith.mulf %2, %2 : vector<128x128xf32>
    %cst_9 = arith.constant dense<0.000000e+00> : vector<128xf32>
    %11 = vector.multi_reduction <add>, %10, %cst_9 [0] : vector<128x128xf32> to vector<128xf32>
    %12 = vector.shape_cast %11 : vector<128xf32> to vector<1x128xf32>
    %c0_10 = arith.constant 0 : index
    %c0_11 = arith.constant 0 : index
    %c0_12 = arith.constant 0 : index
    %13 = vector.load %arg5[%c0_10, %c0_11, %c0_12] : memref<1x1x128xf32, #tpu.memory_space<vmem>>, vector<1x1x128xf32>
    %14 = vector.shape_cast %13 : vector<1x1x128xf32> to vector<1x128xf32>
    %15 = vector.shape_cast %12 : vector<1x128xf32> to vector<1x1x128xf32>
    tpu.vector_store %arg5[%c0_10, %c0_11, %c0_12], %15 {strides = array<i32>} : memref<1x1x128xf32, #tpu.memory_space<vmem>>, vector<1x1x128xf32>,
    return
  }
  func.func @transform_0(%arg0: i32) -> (i32, i32) {
    %c0_i32 = arith.constant 0 : i32
    %c0_i32_0 = arith.constant 0 : i32
    return %arg0, %c0_i32 : i32, i32
  }
  func.func @transform_1(%arg0: i32) -> (i32, i32) {
    %c0_i32 = arith.constant 0 : i32
    %c0_i32_0 = arith.constant 0 : i32
    %c0_i32_1 = arith.constant 0 : i32
    return %c0_i32, %c0_i32_0 : i32, i32
  }
  func.func @transform_2(%arg0: i32) -> (i32, i32) {
    %c0_i32 = arith.constant 0 : i32
    %c0_i32_0 = arith.constant 0 : i32
    return %arg0, %c0_i32 : i32, i32
  }
  func.func @transform_3(%arg0: i32) -> (i32, i32, i32) {
    %c0_i32 = arith.constant 0 : i32
    %c0_i32_0 = arith.constant 0 : i32
    %c0_i32_1 = arith.constant 0 : i32
    return %arg0, %c0_i32, %c0_i32_0 : i32, i32, i32
  }
  func.func @transform_4(%arg0: i32) -> (i32, i32, i32) {
    %c0_i32 = arith.constant 0 : i32
    %c0_i32_0 = arith.constant 0 : i32
    %c0_i32_1 = arith.constant 0 : i32
    return %arg0, %c0_i32, %c0_i32_0 : i32, i32, i32
  }
}

module attributes {stable_mosaic.version = 11 : i64} {
  func.func @_conv3x3_s1_kernel(%arg0: i32, %arg1: memref<1x8x8x128xbf16, #tpu.memory_space<vmem>>, %arg2: memref<1x128xf32, #tpu.memory_space<vmem>>, %arg3: memref<1x128xf32, #tpu.memory_space<vmem>>, %arg4: memref<9x128x128xbf16, #tpu.memory_space<vmem>>, %arg5: memref<1x64x128xbf16, #tpu.memory_space<vmem>>, %arg6: memref<1x1x128xf32, #tpu.memory_space<vmem>>, %arg7: memref<1x1x128xf32, #tpu.memory_space<vmem>>, %arg8: memref<10x10x128xbf16, #tpu.memory_space<vmem>>) attributes {dimension_semantics = [#tpu.dimension_semantics<parallel>], iteration_bounds = array<i64: 2>, scalar_prefetch = 0 : i64, scratch_operands = 1 : i64, tpu.core_type = #tpu.core_type<tc>, window_params = [{transform_indices = @transform_0, window_bounds = array<i64: 1, 8, 8, 128>}, {pipeline_mode = #tpu.pipeline_mode<synchronous>, transform_indices = @transform_1, window_bounds = array<i64: 1, 128>}, {pipeline_mode = #tpu.pipeline_mode<synchronous>, transform_indices = @transform_2, window_bounds = array<i64: 1, 128>}, {pipeline_mode = #tpu.pipeline_mode<synchronous>, transform_indices = @transform_3, window_bounds = array<i64: 9, 128, 128>}, {transform_indices = @transform_4, window_bounds = array<i64: 1, 64, 128>}, {transform_indices = @transform_5, window_bounds = array<i64: 1, 1, 128>}, {transform_indices = @transform_6, window_bounds = array<i64: 1, 1, 128>}]} {
    %cst = arith.constant 0.000000e+00 : bf16
    %0 = vector.broadcast %cst : bf16 to vector<10x10x128xbf16>
    %c0 = arith.constant 0 : index
    %c0_0 = arith.constant 0 : index
    %c0_1 = arith.constant 0 : index
    %1 = vector.load %arg8[%c0, %c0_0, %c0_1] : memref<10x10x128xbf16, #tpu.memory_space<vmem>>, vector<10x10x128xbf16>
    tpu.vector_store %arg8[%c0, %c0_0, %c0_1], %0 {strides = array<i32>} : memref<10x10x128xbf16, #tpu.memory_space<vmem>>, vector<10x10x128xbf16>,
    %c0_2 = arith.constant 0 : index
    %c0_3 = arith.constant 0 : index
    %c0_4 = arith.constant 0 : index
    %c0_5 = arith.constant 0 : index
    %2 = vector.load %arg1[%c0_2, %c0_3, %c0_4, %c0_5] : memref<1x8x8x128xbf16, #tpu.memory_space<vmem>>, vector<1x8x8x128xbf16>
    %3 = vector.shape_cast %2 : vector<1x8x8x128xbf16> to vector<8x8x128xbf16>
    %c0_6 = arith.constant 0 : index
    %c0_7 = arith.constant 0 : index
    %4 = vector.load %arg2[%c0_6, %c0_7] : memref<1x128xf32, #tpu.memory_space<vmem>>, vector<1x128xf32>
    %5 = vector.shape_cast %4 : vector<1x128xf32> to vector<1x1x128xf32>
    %c0_8 = arith.constant 0 : index
    %c0_9 = arith.constant 0 : index
    %6 = vector.load %arg3[%c0_8, %c0_9] : memref<1x128xf32, #tpu.memory_space<vmem>>, vector<1x128xf32>
    %7 = vector.shape_cast %6 : vector<1x128xf32> to vector<1x1x128xf32>
    %8 = arith.extf %3 : vector<8x8x128xbf16> to vector<8x8x128xf32>
    %9 = vector.broadcast %5 : vector<1x1x128xf32> to vector<8x8x128xf32>
    %10 = arith.mulf %8, %9 : vector<8x8x128xf32>
    %11 = vector.broadcast %7 : vector<1x1x128xf32> to vector<8x8x128xf32>
    %12 = arith.addf %10, %11 : vector<8x8x128xf32>
    %cst_10 = arith.constant 0.000000e+00 : f32
    %13 = vector.broadcast %cst_10 : f32 to vector<8x8x128xf32>
    %14 = arith.maximumf %12, %13 : vector<8x8x128xf32>
    %15 = arith.truncf %14 : vector<8x8x128xf32> to vector<8x8x128xbf16>
    %c1 = arith.constant 1 : index
    %c1_11 = arith.constant 1 : index
    %c0_12 = arith.constant 0 : index
    %16 = vector.load %arg8[%c1, %c1_11, %c0_12] : memref<10x10x128xbf16, #tpu.memory_space<vmem>>, vector<8x8x128xbf16>
    tpu.vector_store %arg8[%c1, %c1_11, %c0_12], %15 {strides = array<i32>} : memref<10x10x128xbf16, #tpu.memory_space<vmem>>, vector<8x8x128xbf16>,
    %cst_13 = arith.constant 0.000000e+00 : f32
    %17 = vector.broadcast %cst_13 : f32 to vector<64x128xf32>
    %c0_14 = arith.constant 0 : index
    %c0_15 = arith.constant 0 : index
    %c0_16 = arith.constant 0 : index
    %18 = vector.load %arg8[%c0_14, %c0_15, %c0_16] : memref<10x10x128xbf16, #tpu.memory_space<vmem>>, vector<8x8x128xbf16>
    %19 = vector.shape_cast %18 : vector<8x8x128xbf16> to vector<64x128xbf16>
    %c0_17 = arith.constant 0 : index
    %c0_18 = arith.constant 0 : index
    %c0_19 = arith.constant 0 : index
    %20 = vector.load %arg4[%c0_17, %c0_18, %c0_19] : memref<9x128x128xbf16, #tpu.memory_space<vmem>>, vector<1x128x128xbf16>
    %21 = vector.shape_cast %20 : vector<1x128x128xbf16> to vector<128x128xbf16>
    %cst_20 = arith.constant dense<0.000000e+00> : vector<64x128xf32>
    %22 = tpu.matmul %19, %21, %cst_20 {dimension_numbers = #tpu.dot_dimension_numbers<[1], [0], [0], [1], [0, 0, 1, 1], [], []>} : vector<64x128xbf16>, vector<128x128xbf16>, vector<64x128xf32> -> vector<64x128xf32>
    %23 = arith.addf %17, %22 : vector<64x128xf32>
    %c0_21 = arith.constant 0 : index
    %c1_22 = arith.constant 1 : index
    %c0_23 = arith.constant 0 : index
    %24 = vector.load %arg8[%c0_21, %c1_22, %c0_23] : memref<10x10x128xbf16, #tpu.memory_space<vmem>>, vector<8x8x128xbf16>
    %25 = vector.shape_cast %24 : vector<8x8x128xbf16> to vector<64x128xbf16>
    %c1_24 = arith.constant 1 : index
    %c0_25 = arith.constant 0 : index
    %c0_26 = arith.constant 0 : index
    %26 = vector.load %arg4[%c1_24, %c0_25, %c0_26] : memref<9x128x128xbf16, #tpu.memory_space<vmem>>, vector<1x128x128xbf16>
    %27 = vector.shape_cast %26 : vector<1x128x128xbf16> to vector<128x128xbf16>
    %cst_27 = arith.constant dense<0.000000e+00> : vector<64x128xf32>
    %28 = tpu.matmul %25, %27, %cst_27 {dimension_numbers = #tpu.dot_dimension_numbers<[1], [0], [0], [1], [0, 0, 1, 1], [], []>} : vector<64x128xbf16>, vector<128x128xbf16>, vector<64x128xf32> -> vector<64x128xf32>
    %29 = arith.addf %23, %28 : vector<64x128xf32>
    %c0_28 = arith.constant 0 : index
    %c2 = arith.constant 2 : index
    %c0_29 = arith.constant 0 : index
    %30 = vector.load %arg8[%c0_28, %c2, %c0_29] : memref<10x10x128xbf16, #tpu.memory_space<vmem>>, vector<8x8x128xbf16>
    %31 = vector.shape_cast %30 : vector<8x8x128xbf16> to vector<64x128xbf16>
    %c2_30 = arith.constant 2 : index
    %c0_31 = arith.constant 0 : index
    %c0_32 = arith.constant 0 : index
    %32 = vector.load %arg4[%c2_30, %c0_31, %c0_32] : memref<9x128x128xbf16, #tpu.memory_space<vmem>>, vector<1x128x128xbf16>
    %33 = vector.shape_cast %32 : vector<1x128x128xbf16> to vector<128x128xbf16>
    %cst_33 = arith.constant dense<0.000000e+00> : vector<64x128xf32>
    %34 = tpu.matmul %31, %33, %cst_33 {dimension_numbers = #tpu.dot_dimension_numbers<[1], [0], [0], [1], [0, 0, 1, 1], [], []>} : vector<64x128xbf16>, vector<128x128xbf16>, vector<64x128xf32> -> vector<64x128xf32>
    %35 = arith.addf %29, %34 : vector<64x128xf32>
    %c1_34 = arith.constant 1 : index
    %c0_35 = arith.constant 0 : index
    %c0_36 = arith.constant 0 : index
    %36 = vector.load %arg8[%c1_34, %c0_35, %c0_36] : memref<10x10x128xbf16, #tpu.memory_space<vmem>>, vector<8x8x128xbf16>
    %37 = vector.shape_cast %36 : vector<8x8x128xbf16> to vector<64x128xbf16>
    %c3 = arith.constant 3 : index
    %c0_37 = arith.constant 0 : index
    %c0_38 = arith.constant 0 : index
    %38 = vector.load %arg4[%c3, %c0_37, %c0_38] : memref<9x128x128xbf16, #tpu.memory_space<vmem>>, vector<1x128x128xbf16>
    %39 = vector.shape_cast %38 : vector<1x128x128xbf16> to vector<128x128xbf16>
    %cst_39 = arith.constant dense<0.000000e+00> : vector<64x128xf32>
    %40 = tpu.matmul %37, %39, %cst_39 {dimension_numbers = #tpu.dot_dimension_numbers<[1], [0], [0], [1], [0, 0, 1, 1], [], []>} : vector<64x128xbf16>, vector<128x128xbf16>, vector<64x128xf32> -> vector<64x128xf32>
    %41 = arith.addf %35, %40 : vector<64x128xf32>
    %c1_40 = arith.constant 1 : index
    %c1_41 = arith.constant 1 : index
    %c0_42 = arith.constant 0 : index
    %42 = vector.load %arg8[%c1_40, %c1_41, %c0_42] : memref<10x10x128xbf16, #tpu.memory_space<vmem>>, vector<8x8x128xbf16>
    %43 = vector.shape_cast %42 : vector<8x8x128xbf16> to vector<64x128xbf16>
    %c4 = arith.constant 4 : index
    %c0_43 = arith.constant 0 : index
    %c0_44 = arith.constant 0 : index
    %44 = vector.load %arg4[%c4, %c0_43, %c0_44] : memref<9x128x128xbf16, #tpu.memory_space<vmem>>, vector<1x128x128xbf16>
    %45 = vector.shape_cast %44 : vector<1x128x128xbf16> to vector<128x128xbf16>
    %cst_45 = arith.constant dense<0.000000e+00> : vector<64x128xf32>
    %46 = tpu.matmul %43, %45, %cst_45 {dimension_numbers = #tpu.dot_dimension_numbers<[1], [0], [0], [1], [0, 0, 1, 1], [], []>} : vector<64x128xbf16>, vector<128x128xbf16>, vector<64x128xf32> -> vector<64x128xf32>
    %47 = arith.addf %41, %46 : vector<64x128xf32>
    %c1_46 = arith.constant 1 : index
    %c2_47 = arith.constant 2 : index
    %c0_48 = arith.constant 0 : index
    %48 = vector.load %arg8[%c1_46, %c2_47, %c0_48] : memref<10x10x128xbf16, #tpu.memory_space<vmem>>, vector<8x8x128xbf16>
    %49 = vector.shape_cast %48 : vector<8x8x128xbf16> to vector<64x128xbf16>
    %c5 = arith.constant 5 : index
    %c0_49 = arith.constant 0 : index
    %c0_50 = arith.constant 0 : index
    %50 = vector.load %arg4[%c5, %c0_49, %c0_50] : memref<9x128x128xbf16, #tpu.memory_space<vmem>>, vector<1x128x128xbf16>
    %51 = vector.shape_cast %50 : vector<1x128x128xbf16> to vector<128x128xbf16>
    %cst_51 = arith.constant dense<0.000000e+00> : vector<64x128xf32>
    %52 = tpu.matmul %49, %51, %cst_51 {dimension_numbers = #tpu.dot_dimension_numbers<[1], [0], [0], [1], [0, 0, 1, 1], [], []>} : vector<64x128xbf16>, vector<128x128xbf16>, vector<64x128xf32> -> vector<64x128xf32>
    %53 = arith.addf %47, %52 : vector<64x128xf32>
    %c2_52 = arith.constant 2 : index
    %c0_53 = arith.constant 0 : index
    %c0_54 = arith.constant 0 : index
    %54 = vector.load %arg8[%c2_52, %c0_53, %c0_54] : memref<10x10x128xbf16, #tpu.memory_space<vmem>>, vector<8x8x128xbf16>
    %55 = vector.shape_cast %54 : vector<8x8x128xbf16> to vector<64x128xbf16>
    %c6 = arith.constant 6 : index
    %c0_55 = arith.constant 0 : index
    %c0_56 = arith.constant 0 : index
    %56 = vector.load %arg4[%c6, %c0_55, %c0_56] : memref<9x128x128xbf16, #tpu.memory_space<vmem>>, vector<1x128x128xbf16>
    %57 = vector.shape_cast %56 : vector<1x128x128xbf16> to vector<128x128xbf16>
    %cst_57 = arith.constant dense<0.000000e+00> : vector<64x128xf32>
    %58 = tpu.matmul %55, %57, %cst_57 {dimension_numbers = #tpu.dot_dimension_numbers<[1], [0], [0], [1], [0, 0, 1, 1], [], []>} : vector<64x128xbf16>, vector<128x128xbf16>, vector<64x128xf32> -> vector<64x128xf32>
    %59 = arith.addf %53, %58 : vector<64x128xf32>
    %c2_58 = arith.constant 2 : index
    %c1_59 = arith.constant 1 : index
    %c0_60 = arith.constant 0 : index
    %60 = vector.load %arg8[%c2_58, %c1_59, %c0_60] : memref<10x10x128xbf16, #tpu.memory_space<vmem>>, vector<8x8x128xbf16>
    %61 = vector.shape_cast %60 : vector<8x8x128xbf16> to vector<64x128xbf16>
    %c7 = arith.constant 7 : index
    %c0_61 = arith.constant 0 : index
    %c0_62 = arith.constant 0 : index
    %62 = vector.load %arg4[%c7, %c0_61, %c0_62] : memref<9x128x128xbf16, #tpu.memory_space<vmem>>, vector<1x128x128xbf16>
    %63 = vector.shape_cast %62 : vector<1x128x128xbf16> to vector<128x128xbf16>
    %cst_63 = arith.constant dense<0.000000e+00> : vector<64x128xf32>
    %64 = tpu.matmul %61, %63, %cst_63 {dimension_numbers = #tpu.dot_dimension_numbers<[1], [0], [0], [1], [0, 0, 1, 1], [], []>} : vector<64x128xbf16>, vector<128x128xbf16>, vector<64x128xf32> -> vector<64x128xf32>
    %65 = arith.addf %59, %64 : vector<64x128xf32>
    %c2_64 = arith.constant 2 : index
    %c2_65 = arith.constant 2 : index
    %c0_66 = arith.constant 0 : index
    %66 = vector.load %arg8[%c2_64, %c2_65, %c0_66] : memref<10x10x128xbf16, #tpu.memory_space<vmem>>, vector<8x8x128xbf16>
    %67 = vector.shape_cast %66 : vector<8x8x128xbf16> to vector<64x128xbf16>
    %c8 = arith.constant 8 : index
    %c0_67 = arith.constant 0 : index
    %c0_68 = arith.constant 0 : index
    %68 = vector.load %arg4[%c8, %c0_67, %c0_68] : memref<9x128x128xbf16, #tpu.memory_space<vmem>>, vector<1x128x128xbf16>
    %69 = vector.shape_cast %68 : vector<1x128x128xbf16> to vector<128x128xbf16>
    %cst_69 = arith.constant dense<0.000000e+00> : vector<64x128xf32>
    %70 = tpu.matmul %67, %69, %cst_69 {dimension_numbers = #tpu.dot_dimension_numbers<[1], [0], [0], [1], [0, 0, 1, 1], [], []>} : vector<64x128xbf16>, vector<128x128xbf16>, vector<64x128xf32> -> vector<64x128xf32>
    %71 = arith.addf %65, %70 : vector<64x128xf32>
    %72 = arith.truncf %71 : vector<64x128xf32> to vector<64x128xbf16>
    %c0_70 = arith.constant 0 : index
    %c0_71 = arith.constant 0 : index
    %c0_72 = arith.constant 0 : index
    %73 = vector.load %arg5[%c0_70, %c0_71, %c0_72] : memref<1x64x128xbf16, #tpu.memory_space<vmem>>, vector<1x64x128xbf16>
    %74 = vector.shape_cast %73 : vector<1x64x128xbf16> to vector<64x128xbf16>
    %75 = vector.shape_cast %72 : vector<64x128xbf16> to vector<1x64x128xbf16>
    tpu.vector_store %arg5[%c0_70, %c0_71, %c0_72], %75 {strides = array<i32>} : memref<1x64x128xbf16, #tpu.memory_space<vmem>>, vector<1x64x128xbf16>,
    %cst_73 = arith.constant dense<0.000000e+00> : vector<128xf32>
    %76 = vector.multi_reduction <add>, %71, %cst_73 [0] : vector<64x128xf32> to vector<128xf32>
    %77 = vector.shape_cast %76 : vector<128xf32> to vector<1x128xf32>
    %c0_74 = arith.constant 0 : index
    %c0_75 = arith.constant 0 : index
    %c0_76 = arith.constant 0 : index
    %78 = vector.load %arg6[%c0_74, %c0_75, %c0_76] : memref<1x1x128xf32, #tpu.memory_space<vmem>>, vector<1x1x128xf32>
    %79 = vector.shape_cast %78 : vector<1x1x128xf32> to vector<1x128xf32>
    %80 = vector.shape_cast %77 : vector<1x128xf32> to vector<1x1x128xf32>
    tpu.vector_store %arg6[%c0_74, %c0_75, %c0_76], %80 {strides = array<i32>} : memref<1x1x128xf32, #tpu.memory_space<vmem>>, vector<1x1x128xf32>,
    %81 = arith.mulf %71, %71 : vector<64x128xf32>
    %cst_77 = arith.constant dense<0.000000e+00> : vector<128xf32>
    %82 = vector.multi_reduction <add>, %81, %cst_77 [0] : vector<64x128xf32> to vector<128xf32>
    %83 = vector.shape_cast %82 : vector<128xf32> to vector<1x128xf32>
    %c0_78 = arith.constant 0 : index
    %c0_79 = arith.constant 0 : index
    %c0_80 = arith.constant 0 : index
    %84 = vector.load %arg7[%c0_78, %c0_79, %c0_80] : memref<1x1x128xf32, #tpu.memory_space<vmem>>, vector<1x1x128xf32>
    %85 = vector.shape_cast %84 : vector<1x1x128xf32> to vector<1x128xf32>
    %86 = vector.shape_cast %83 : vector<1x128xf32> to vector<1x1x128xf32>
    tpu.vector_store %arg7[%c0_78, %c0_79, %c0_80], %86 {strides = array<i32>} : memref<1x1x128xf32, #tpu.memory_space<vmem>>, vector<1x1x128xf32>,
    return
  }
  func.func @transform_0(%arg0: i32) -> (i32, i32, i32, i32) {
    %c0_i32 = arith.constant 0 : i32
    %c0_i32_0 = arith.constant 0 : i32
    %c0_i32_1 = arith.constant 0 : i32
    %c0_i32_2 = arith.constant 0 : i32
    return %arg0, %c0_i32, %c0_i32_0, %c0_i32_1 : i32, i32, i32, i32
  }
  func.func @transform_1(%arg0: i32) -> (i32, i32) {
    %c0_i32 = arith.constant 0 : i32
    %c0_i32_0 = arith.constant 0 : i32
    %c0_i32_1 = arith.constant 0 : i32
    return %c0_i32, %c0_i32_0 : i32, i32
  }
  func.func @transform_2(%arg0: i32) -> (i32, i32) {
    %c0_i32 = arith.constant 0 : i32
    %c0_i32_0 = arith.constant 0 : i32
    %c0_i32_1 = arith.constant 0 : i32
    return %c0_i32, %c0_i32_0 : i32, i32
  }
  func.func @transform_3(%arg0: i32) -> (i32, i32, i32) {
    %c0_i32 = arith.constant 0 : i32
    %c0_i32_0 = arith.constant 0 : i32
    %c0_i32_1 = arith.constant 0 : i32
    %c0_i32_2 = arith.constant 0 : i32
    return %c0_i32, %c0_i32_0, %c0_i32_1 : i32, i32, i32
  }
  func.func @transform_4(%arg0: i32) -> (i32, i32, i32) {
    %c0_i32 = arith.constant 0 : i32
    %c0_i32_0 = arith.constant 0 : i32
    %c0_i32_1 = arith.constant 0 : i32
    return %arg0, %c0_i32, %c0_i32_0 : i32, i32, i32
  }
  func.func @transform_5(%arg0: i32) -> (i32, i32, i32) {
    %c0_i32 = arith.constant 0 : i32
    %c0_i32_0 = arith.constant 0 : i32
    %c0_i32_1 = arith.constant 0 : i32
    return %arg0, %c0_i32, %c0_i32_0 : i32, i32, i32
  }
  func.func @transform_6(%arg0: i32) -> (i32, i32, i32) {
    %c0_i32 = arith.constant 0 : i32
    %c0_i32_0 = arith.constant 0 : i32
    %c0_i32_1 = arith.constant 0 : i32
    return %arg0, %c0_i32, %c0_i32_0 : i32, i32, i32
  }
}

module attributes {stable_mosaic.version = 11 : i64} {
  func.func @_bn_residual_kernel(%arg0: i32, %arg1: memref<128x128xbf16, #tpu.memory_space<vmem>>, %arg2: memref<1x128xf32, #tpu.memory_space<vmem>>, %arg3: memref<1x128xf32, #tpu.memory_space<vmem>>, %arg4: memref<128x128xbf16, #tpu.memory_space<vmem>>, %arg5: memref<1x128xf32, #tpu.memory_space<vmem>>, %arg6: memref<1x128xf32, #tpu.memory_space<vmem>>, %arg7: memref<128x128xf32, #tpu.memory_space<vmem>>) attributes {dimension_semantics = [#tpu.dimension_semantics<parallel>], iteration_bounds = array<i64: 1>, scalar_prefetch = 0 : i64, scratch_operands = 0 : i64, tpu.core_type = #tpu.core_type<tc>, window_params = [{transform_indices = @transform_0, window_bounds = array<i64: 128, 128>}, {pipeline_mode = #tpu.pipeline_mode<synchronous>, transform_indices = @transform_1, window_bounds = array<i64: 1, 128>}, {pipeline_mode = #tpu.pipeline_mode<synchronous>, transform_indices = @transform_2, window_bounds = array<i64: 1, 128>}, {transform_indices = @transform_3, window_bounds = array<i64: 128, 128>}, {pipeline_mode = #tpu.pipeline_mode<synchronous>, transform_indices = @transform_4, window_bounds = array<i64: 1, 128>}, {pipeline_mode = #tpu.pipeline_mode<synchronous>, transform_indices = @transform_5, window_bounds = array<i64: 1, 128>}, {transform_indices = @transform_6, window_bounds = array<i64: 128, 128>}]} {
    %c0 = arith.constant 0 : index
    %c0_0 = arith.constant 0 : index
    %0 = vector.load %arg1[%c0, %c0_0] : memref<128x128xbf16, #tpu.memory_space<vmem>>, vector<128x128xbf16>
    %1 = arith.extf %0 : vector<128x128xbf16> to vector<128x128xf32>
    %c0_1 = arith.constant 0 : index
    %c0_2 = arith.constant 0 : index
    %2 = vector.load %arg2[%c0_1, %c0_2] : memref<1x128xf32, #tpu.memory_space<vmem>>, vector<1x128xf32>
    %3 = vector.broadcast %2 : vector<1x128xf32> to vector<128x128xf32>
    %4 = arith.mulf %1, %3 : vector<128x128xf32>
    %c0_3 = arith.constant 0 : index
    %c0_4 = arith.constant 0 : index
    %5 = vector.load %arg3[%c0_3, %c0_4] : memref<1x128xf32, #tpu.memory_space<vmem>>, vector<1x128xf32>
    %6 = vector.broadcast %5 : vector<1x128xf32> to vector<128x128xf32>
    %7 = arith.addf %4, %6 : vector<128x128xf32>
    %c0_5 = arith.constant 0 : index
    %c0_6 = arith.constant 0 : index
    %8 = vector.load %arg4[%c0_5, %c0_6] : memref<128x128xbf16, #tpu.memory_space<vmem>>, vector<128x128xbf16>
    %9 = arith.extf %8 : vector<128x128xbf16> to vector<128x128xf32>
    %c0_7 = arith.constant 0 : index
    %c0_8 = arith.constant 0 : index
    %10 = vector.load %arg5[%c0_7, %c0_8] : memref<1x128xf32, #tpu.memory_space<vmem>>, vector<1x128xf32>
    %11 = vector.broadcast %10 : vector<1x128xf32> to vector<128x128xf32>
    %12 = arith.mulf %9, %11 : vector<128x128xf32>
    %c0_9 = arith.constant 0 : index
    %c0_10 = arith.constant 0 : index
    %13 = vector.load %arg6[%c0_9, %c0_10] : memref<1x128xf32, #tpu.memory_space<vmem>>, vector<1x128xf32>
    %14 = vector.broadcast %13 : vector<1x128xf32> to vector<128x128xf32>
    %15 = arith.addf %12, %14 : vector<128x128xf32>
    %16 = arith.addf %7, %15 : vector<128x128xf32>
    %cst = arith.constant 0.000000e+00 : f32
    %17 = vector.broadcast %cst : f32 to vector<128x128xf32>
    %18 = arith.maximumf %16, %17 : vector<128x128xf32>
    %c0_11 = arith.constant 0 : index
    %c0_12 = arith.constant 0 : index
    %19 = vector.load %arg7[%c0_11, %c0_12] : memref<128x128xf32, #tpu.memory_space<vmem>>, vector<128x128xf32>
    tpu.vector_store %arg7[%c0_11, %c0_12], %18 {strides = array<i32>} : memref<128x128xf32, #tpu.memory_space<vmem>>, vector<128x128xf32>,
    return
  }
  func.func @transform_0(%arg0: i32) -> (i32, i32) {
    %c0_i32 = arith.constant 0 : i32
    %c0_i32_0 = arith.constant 0 : i32
    return %arg0, %c0_i32 : i32, i32
  }
  func.func @transform_1(%arg0: i32) -> (i32, i32) {
    %c0_i32 = arith.constant 0 : i32
    %c0_i32_0 = arith.constant 0 : i32
    %c0_i32_1 = arith.constant 0 : i32
    return %c0_i32, %c0_i32_0 : i32, i32
  }
  func.func @transform_2(%arg0: i32) -> (i32, i32) {
    %c0_i32 = arith.constant 0 : i32
    %c0_i32_0 = arith.constant 0 : i32
    %c0_i32_1 = arith.constant 0 : i32
    return %c0_i32, %c0_i32_0 : i32, i32
  }
  func.func @transform_3(%arg0: i32) -> (i32, i32) {
    %c0_i32 = arith.constant 0 : i32
    %c0_i32_0 = arith.constant 0 : i32
    return %arg0, %c0_i32 : i32, i32
  }
  func.func @transform_4(%arg0: i32) -> (i32, i32) {
    %c0_i32 = arith.constant 0 : i32
    %c0_i32_0 = arith.constant 0 : i32
    %c0_i32_1 = arith.constant 0 : i32
    return %c0_i32, %c0_i32_0 : i32, i32
  }
  func.func @transform_5(%arg0: i32) -> (i32, i32) {
    %c0_i32 = arith.constant 0 : i32
    %c0_i32_0 = arith.constant 0 : i32
    %c0_i32_1 = arith.constant 0 : i32
    return %c0_i32, %c0_i32_0 : i32, i32
  }
  func.func @transform_6(%arg0: i32) -> (i32, i32) {
    %c0_i32 = arith.constant 0 : i32
    %c0_i32_0 = arith.constant 0 : i32
    return %arg0, %c0_i32 : i32, i32
  }
}

module attributes {stable_mosaic.version = 11 : i64} {
  func.func @_matmul_stats_kernel(%arg0: i32, %arg1: memref<128x4xbf16, #tpu.memory_space<vmem>>, %arg2: memref<4x128xbf16, #tpu.memory_space<vmem>>, %arg3: memref<128x128xbf16, #tpu.memory_space<vmem>>, %arg4: memref<1x1x128xf32, #tpu.memory_space<vmem>>, %arg5: memref<1x1x128xf32, #tpu.memory_space<vmem>>) attributes {dimension_semantics = [#tpu.dimension_semantics<parallel>], iteration_bounds = array<i64: 1>, scalar_prefetch = 0 : i64, scratch_operands = 0 : i64, tpu.core_type = #tpu.core_type<tc>, window_params = [{transform_indices = @transform_0, window_bounds = array<i64: 128, 4>}, {pipeline_mode = #tpu.pipeline_mode<synchronous>, transform_indices = @transform_1, window_bounds = array<i64: 4, 128>}, {transform_indices = @transform_2, window_bounds = array<i64: 128, 128>}, {transform_indices = @transform_3, window_bounds = array<i64: 1, 1, 128>}, {transform_indices = @transform_4, window_bounds = array<i64: 1, 1, 128>}]} {
    %c0 = arith.constant 0 : index
    %c0_0 = arith.constant 0 : index
    %0 = vector.load %arg1[%c0, %c0_0] : memref<128x4xbf16, #tpu.memory_space<vmem>>, vector<128x4xbf16>
    %c0_1 = arith.constant 0 : index
    %c0_2 = arith.constant 0 : index
    %1 = vector.load %arg2[%c0_1, %c0_2] : memref<4x128xbf16, #tpu.memory_space<vmem>>, vector<4x128xbf16>
    %cst = arith.constant dense<0.000000e+00> : vector<128x128xf32>
    %2 = tpu.matmul %0, %1, %cst {dimension_numbers = #tpu.dot_dimension_numbers<[1], [0], [0], [1], [0, 0, 1, 1], [], []>} : vector<128x4xbf16>, vector<4x128xbf16>, vector<128x128xf32> -> vector<128x128xf32>
    %3 = arith.truncf %2 : vector<128x128xf32> to vector<128x128xbf16>
    %c0_3 = arith.constant 0 : index
    %c0_4 = arith.constant 0 : index
    %4 = vector.load %arg3[%c0_3, %c0_4] : memref<128x128xbf16, #tpu.memory_space<vmem>>, vector<128x128xbf16>
    tpu.vector_store %arg3[%c0_3, %c0_4], %3 {strides = array<i32>} : memref<128x128xbf16, #tpu.memory_space<vmem>>, vector<128x128xbf16>,
    %cst_5 = arith.constant dense<0.000000e+00> : vector<128xf32>
    %5 = vector.multi_reduction <add>, %2, %cst_5 [0] : vector<128x128xf32> to vector<128xf32>
    %6 = vector.shape_cast %5 : vector<128xf32> to vector<1x128xf32>
    %c0_6 = arith.constant 0 : index
    %c0_7 = arith.constant 0 : index
    %c0_8 = arith.constant 0 : index
    %7 = vector.load %arg4[%c0_6, %c0_7, %c0_8] : memref<1x1x128xf32, #tpu.memory_space<vmem>>, vector<1x1x128xf32>
    %8 = vector.shape_cast %7 : vector<1x1x128xf32> to vector<1x128xf32>
    %9 = vector.shape_cast %6 : vector<1x128xf32> to vector<1x1x128xf32>
    tpu.vector_store %arg4[%c0_6, %c0_7, %c0_8], %9 {strides = array<i32>} : memref<1x1x128xf32, #tpu.memory_space<vmem>>, vector<1x1x128xf32>,
    %10 = arith.mulf %2, %2 : vector<128x128xf32>
    %cst_9 = arith.constant dense<0.000000e+00> : vector<128xf32>
    %11 = vector.multi_reduction <add>, %10, %cst_9 [0] : vector<128x128xf32> to vector<128xf32>
    %12 = vector.shape_cast %11 : vector<128xf32> to vector<1x128xf32>
    %c0_10 = arith.constant 0 : index
    %c0_11 = arith.constant 0 : index
    %c0_12 = arith.constant 0 : index
    %13 = vector.load %arg5[%c0_10, %c0_11, %c0_12] : memref<1x1x128xf32, #tpu.memory_space<vmem>>, vector<1x1x128xf32>
    %14 = vector.shape_cast %13 : vector<1x1x128xf32> to vector<1x128xf32>
    %15 = vector.shape_cast %12 : vector<1x128xf32> to vector<1x1x128xf32>
    tpu.vector_store %arg5[%c0_10, %c0_11, %c0_12], %15 {strides = array<i32>} : memref<1x1x128xf32, #tpu.memory_space<vmem>>, vector<1x1x128xf32>,
    return
  }
  func.func @transform_0(%arg0: i32) -> (i32, i32) {
    %c0_i32 = arith.constant 0 : i32
    %c0_i32_0 = arith.constant 0 : i32
    return %arg0, %c0_i32 : i32, i32
  }
  func.func @transform_1(%arg0: i32) -> (i32, i32) {
    %c0_i32 = arith.constant 0 : i32
    %c0_i32_0 = arith.constant 0 : i32
    %c0_i32_1 = arith.constant 0 : i32
    return %c0_i32, %c0_i32_0 : i32, i32
  }
  func.func @transform_2(%arg0: i32) -> (i32, i32) {
    %c0_i32 = arith.constant 0 : i32
    %c0_i32_0 = arith.constant 0 : i32
    return %arg0, %c0_i32 : i32, i32
  }
  func.func @transform_3(%arg0: i32) -> (i32, i32, i32) {
    %c0_i32 = arith.constant 0 : i32
    %c0_i32_0 = arith.constant 0 : i32
    %c0_i32_1 = arith.constant 0 : i32
    return %arg0, %c0_i32, %c0_i32_0 : i32, i32, i32
  }
  func.func @transform_4(%arg0: i32) -> (i32, i32, i32) {
    %c0_i32 = arith.constant 0 : i32
    %c0_i32_0 = arith.constant 0 : i32
    %c0_i32_1 = arith.constant 0 : i32
    return %arg0, %c0_i32, %c0_i32_0 : i32, i32, i32
  }
}

</mosaic_0001>

<bundles_post_ra>
// kernel: basic_block_forward.4
= control target key start
LH: loop header
LB: loop body
LE: loop exit
PB: predicated region body
PF: predicated region fallthrough
CT: control target
= control target key end

     0   :  { %vm116_vm0 = vcmask 1041408   ;;  %vm91_vm1 = vcmask 293888   ;;  %s615_s1 = inlined_call_operand.vmem [shape: bf16[36,128], index: 1, kind: input, shape index: {}]   ;;  %s616_s0 = inlined_call_operand.vmem [shape: bf16[128,36], index: 0, kind: input, shape index: {}]   ;;  %s617_s2 = inlined_call_operand.vmem [shape: bf16[128,128], index: 2, kind: output, shape index: {0}]   ;;  %s618_s3 = inlined_call_operand.vmem [shape: f32[1,1,128], index: 3, kind: output, shape index: {1}]   ;;  %s619_s4 = inlined_call_operand.vmem [shape: f32[1,1,128], index: 4, kind: output, shape index: {2}]  }
   0x1   :  { %v508_v0 = vld [vmem:[%s615_s1 + $0x10] ss:$0 sps:$4 sm:$0x33]   ;;  %v509_v1 = vld [vmem:[%s615_s1 + $0x8] sm:$0xff]   ;;  %v511_v3 = vld [vmem:[%s616_s0] sm:$0xff]  }
   0x2   :  { %506 = vmatprep.subr.msk.bf16.mxu0 %vm116_vm0, %v508_v0  ;;  %v118_v2 = vsel %vm116_vm0, %v508_v0, 0  ;;  %507 = vmatprep.subr.msk.bf16.mxu1 %vm116_vm0, %v508_v0  ;;  %v510_v4 = vld [vmem:[%s615_s1] sm:$0xff]   ;;  %v512_v6 = vld [vmem:[%s616_s0 + $0x8] sm:$0xff]   ;;  %v513_v8 = vld [vmem:[%s616_s0 + $0x10] sm:$0xff]  }
   0x3   :  { %479 = vmatpush3.bf16.msra.mxu0 %v118_v2  ;;  %503 = vmatpush3.bf16.msra.mxu1 %v118_v2  ;;  %v515_v5 = vld [vmem:[%s616_s0 + $0x20] sm:$0xff]   ;;  %v516_v7 = vld [vmem:[%s616_s0 + $0x28] sm:$0xff]   ;;  %v517_v9 = vld [vmem:[%s616_s0 + $0x30] sm:$0xff]  }
   0x4   :  { %480 = vmatprep.subr.bf16.mxu0 %v509_v1  ;;  %501 = vmatprep.subr.bf16.mxu1 %v509_v1  ;;  %v514_v10 = vld [vmem:[%s616_s0 + $0x18] sm:$0xff]  }
   0x5   :  { %484 = vmatprep.mubr.msk.bf16.mxu0 %vm91_vm1, %v511_v3  ;;  %492 = vmatprep.mubr.msk.bf16.mxu1 %vm91_vm1, %v515_v5  ;;  %v518_v11 = vld [vmem:[%s616_s0 + $0x38] sm:$0xff]  }
   0x7   :  { %481 = vmatpush3.bf16.msra.mxu0 %v509_v1  ;;  %504 = vmatpush3.bf16.msra.mxu1 %v509_v1 }
   0x8   :  { %482 = vmatprep.subr.bf16.mxu0 %v510_v4  ;;  %502 = vmatprep.subr.bf16.mxu1 %v510_v4 }
   0xb   :  { %483 = vmatpush3.bf16.msra.mxu0 %v510_v4  ;;  %505 = vmatpush3.bf16.msra.mxu1 %v510_v4 }
   0xe   :  { %485 = vmatmul.mubr.msk.bf16.vlgmr.msra.gmra.mxu0 %vm91_vm1, %v512_v6  ;;  %493 = vmatmul.mubr.msk.bf16.vlgmr.msra.gmra.mxu1 %vm91_vm1, %v516_v7 }
   0xf   :  { %488 = vmatprep.mubr.msk.bf16.mxu0 %vm91_vm1, %v513_v8  ;;  %496 = vmatprep.mubr.msk.bf16.mxu1 %vm91_vm1, %v517_v9 }
  0x16   :  { %489 = vmatmul.mubr.msk.bf16.gmra.mxu0 %vm91_vm1, %v514_v10  ;;  %497 = vmatmul.mubr.msk.bf16.gmra.mxu1 %vm91_vm1, %v518_v11 }
  0xce   :  { %v486_v12 = vpop.f32.mrf.mxu0  ;;  %v494_v13 = vpop.f32.mrf.mxu1 }
  0xcf   :  { %v321_v29 = vmul.f32 %v486_v12, %v486_v12  ;;  %v329_v63 = vmul.f32 %v494_v13, %v494_v13 }
  0xd0   :  { %v154_v14 = vpop.f32.mrf.mxu0  ;;  %v186_v15 = vpop.f32.mrf.mxu1 }
  0xd1   :  { %v319_v20 = vmul.f32 %v154_v14, %v154_v14  ;;  %v327_v57 = vmul.f32 %v186_v15, %v186_v15 }
  0xd2   :  { %v487_v16 = vpop.f32.mrf.mxu0  ;;  %v495_v17 = vpop.f32.mrf.mxu1 }
  0xd3   :  { %v428_v18 = vpack.c.bf16 %v487_v16, %v486_v12  ;;  %v448_v19 = vpack.c.bf16 %v495_v17, %v494_v13  ;;  %v322_v34 = vmul.f32 %v487_v16, %v487_v16  ;;  %v330_v2 = vmul.f32 %v495_v17, %v495_v17 }
  0xd4   :  { %v157_v21 = vpop.f32.mrf.mxu0  ;;  %v189_v22 = vpop.f32.mrf.mxu1 }
  0xd5   :  { %460 = vst [vmem:[%s617_s2 + $0x8] sm:$0xff] %v428_v18   ;;  %v423_v23 = vpack.c.bf16 %v157_v21, %v154_v14  ;;  %v297_v24 = vadd.f32 %v157_v21, %v154_v14  ;;  %v320_v25 = vmul.f32 %v157_v21, %v157_v21  ;;  %464 = vst [vmem:[%s617_s2 + $0x28] sm:$0xff] %v448_v19  }
  0xd6   :  { %v443_v26 = vpack.c.bf16 %v189_v22, %v186_v15  ;;  %v490_v27 = vpop.f32.mrf.mxu0  ;;  %v498_v28 = vpop.f32.mrf.mxu1  ;;  %v328_v61 = vmul.f32 %v189_v22, %v189_v22 }
  0xd7   :  { %424 = vst [vmem:[%s617_s2] sm:$0xff] %v423_v23   ;;  %v298_v30 = vadd.f32 %v486_v12, %v297_v24  ;;  %v335_v31 = vadd.f32 %v320_v25, %v319_v20  ;;  %v325_v51 = vmul.f32 %v490_v27, %v490_v27  ;;  %v333_v11 = vmul.f32 %v498_v28, %v498_v28 }
  0xd8   :  { %463 = vst [vmem:[%s617_s2 + $0x20] sm:$0xff] %v443_v26   ;;  %v170_v32 = vpop.f32.mrf.mxu0  ;;  %v202_v33 = vpop.f32.mrf.mxu1 }
  0xd9   :  { %v336_v35 = vadd.f32 %v335_v31, %v321_v29  ;;  %v299_v36 = vadd.f32 %v487_v16, %v298_v30  ;;  %v323_v40 = vmul.f32 %v170_v32, %v170_v32  ;;  %v331_v6 = vmul.f32 %v202_v33, %v202_v33 }
  0xda   :  { %v491_v37 = vpop.f32.mrf.mxu0  ;;  %v499_v38 = vpop.f32.mrf.mxu1 }
  0xdb   :  { %v300_v39 = vadd.f32 %v299_v36, %v170_v32  ;;  %v337_v41 = vadd.f32 %v336_v35, %v322_v34  ;;  %v438_v42 = vpack.c.bf16 %v491_v37, %v490_v27  ;;  %v458_v44 = vpack.c.bf16 %v499_v38, %v498_v28 }
  0xdc   :  { %v173_v43 = vpop.f32.mrf.mxu0  ;;  %v205_v45 = vpop.f32.mrf.mxu1  ;;  %v326_v54 = vmul.f32 %v491_v37, %v491_v37  ;;  %v334_v16 = vmul.f32 %v499_v38, %v499_v38 }
  0xdd   :  { %v338_v46 = vadd.f32 %v337_v41, %v323_v40  ;;  %462 = vst [vmem:[%s617_s2 + $0x18] sm:$0xff] %v438_v42   ;;  %v433_v47 = vpack.c.bf16 %v173_v43, %v170_v32  ;;  %v301_v48 = vadd.f32 %v300_v39, %v173_v43  ;;  %v324_v49 = vmul.f32 %v173_v43, %v173_v43 }
  0xde   :  { %466 = vst [vmem:[%s617_s2 + $0x38] sm:$0xff] %v458_v44   ;;  %v453_v50 = vpack.c.bf16 %v205_v45, %v202_v33  ;;  %v332_v10 = vmul.f32 %v205_v45, %v205_v45 }
  0xdf   :  { %461 = vst [vmem:[%s617_s2 + $0x10] sm:$0xff] %v433_v47   ;;  %v302_v52 = vadd.f32 %v490_v27, %v301_v48  ;;  %v339_v53 = vadd.f32 %v338_v46, %v324_v49 }
  0xe0   :  { %465 = vst [vmem:[%s617_s2 + $0x30] sm:$0xff] %v453_v50  }
  0xe1   :  { %v303_v55 = vadd.f32 %v491_v37, %v302_v52  ;;  %v340_v56 = vadd.f32 %v339_v53, %v325_v51 }
  0xe3   :  { %v341_v58 = vadd.f32 %v340_v56, %v326_v54  ;;  %v304_v59 = vadd.f32 %v303_v55, %v186_v15 }
  0xe5   :  { %v305_v60 = vadd.f32 %v304_v59, %v189_v22  ;;  %v342_v62 = vadd.f32 %v341_v58, %v327_v57 }
  0xe7   :  { %v306_v0 = vadd.f32 %v494_v13, %v305_v60  ;;  %v343_v1 = vadd.f32 %v342_v62, %v328_v61 }
  0xe9   :  { %v344_v3 = vadd.f32 %v343_v1, %v329_v63  ;;  %v307_v4 = vadd.f32 %v495_v17, %v306_v0 }
  0xeb   :  { %v308_v5 = vadd.f32 %v307_v4, %v202_v33  ;;  %v345_v7 = vadd.f32 %v344_v3, %v330_v2 }
  0xed   :  { %v346_v8 = vadd.f32 %v345_v7, %v331_v6  ;;  %v309_v9 = vadd.f32 %v308_v5, %v205_v45 }
  0xef   :  { %v310_v12 = vadd.f32 %v498_v28, %v309_v9  ;;  %v347_v14 = vadd.f32 %v346_v8, %v332_v10 }
  0xf1   :  { %v311_v15 = vadd.f32 %v499_v38, %v310_v12  ;;  %v348_v18 = vadd.f32 %v347_v14, %v333_v11 }
  0xf3   :  { %v312_v19 = vrot.slane %v311_v15, 4  ;;  %v349_v20 = vadd.f32 %v348_v18, %v334_v16 }
  0xf5   :  { %v313_v21 = vadd.f32 %v312_v19, %v311_v15  ;;  %v350_v13 = vrot.slane %v349_v20, 4 }
  0xf7   :  { %v314_v22 = vrot.slane %v313_v21, 2  ;;  %v351_v23 = vadd.f32 %v350_v13, %v349_v20 }
  0xf9   :  { %v315_v24 = vadd.f32 %v314_v22, %v313_v21  ;;  %v352_v17 = vrot.slane %v351_v23, 2 }
  0xfb   :  { %v316_v25 = vrot.slane %v315_v24, 1  ;;  %v353_v26 = vadd.f32 %v352_v17, %v351_v23 }
  0xfd   :  { %v317_v27 = vadd.f32 %v316_v25, %v315_v24  ;;  %v354_v29 = vrot.slane %v353_v26, 1 }
  0xff   :  { %318 = vst [vmem:[%s618_s3] sm:$0x1] %v317_v27  ;;  %v355_v28 = vadd.f32 %v354_v29, %v353_v26 }
 0x101   :  { %356 = vst [vmem:[%s619_s4] sm:$0x1] %v355_v28 }

// kernel: basic_block_forward.7
= control target key start
LH: loop header
LB: loop body
LE: loop exit
PB: predicated region body
PF: predicated region fallthrough
CT: control target
= control target key end

     0   :  { %s528_s0 = inlined_call_operand.vmem [shape: bf16[128,128], index: 0, kind: input, shape index: {}]   ;;  %s529_s1 = inlined_call_operand.vmem [shape: f32[1,128], index: 1, kind: input, shape index: {}]   ;;  %s530_s2 = inlined_call_operand.vmem [shape: f32[1,128], index: 2, kind: input, shape index: {}]   ;;  %s531_s3 = inlined_call_operand.vmem [shape: bf16[128,128], index: 3, kind: input, shape index: {}]   ;;  %s532_s4 = inlined_call_operand.vmem [shape: f32[1,128], index: 4, kind: input, shape index: {}]   ;;  %s533_s5 = inlined_call_operand.vmem [shape: f32[1,128], index: 5, kind: input, shape index: {}]   ;;  %s534_s6 = inlined_call_operand.vmem [shape: f32[128,128], index: 6, kind: output, shape index: {}]  }
   0x1   :  { %v236_v0 = vld [vmem:[%s528_s0] sm:$0xff]   ;;  %v299_v9 = vld [vmem:[%s528_s0 + $0x8] sm:$0xff]   ;;  %v300_v20 = vld [vmem:[%s528_s0 + $0x10] sm:$0xff]  }
   0x2   :  { %v354_v1 = vld [vmem:[%s529_s1] ss:$0 sm:$0xff]  ;;  %v237_v2 = vunpack.c.l.bf16 %v236_v0  ;;  %v238_v5 = vunpack.c.h.bf16 %v236_v0  ;;  %v306_v10 = vld [vmem:[%s531_s3 + $0x8] sm:$0xff]   ;;  %v241_v14 = vunpack.c.l.bf16 %v299_v9  ;;  %v242_v18 = vunpack.c.h.bf16 %v299_v9  ;;  %v307_v21 = vld [vmem:[%s531_s3 + $0x10] sm:$0xff]  }
   0x3   :  { %v268_v3 = vld [vmem:[%s531_s3] sm:$0xff]   ;;  %v273_v15 = vunpack.c.l.bf16 %v306_v10  ;;  %v274_v19 = vunpack.c.h.bf16 %v306_v10  ;;  %v245_v32 = vunpack.c.l.bf16 %v300_v20  ;;  %v277_v33 = vunpack.c.l.bf16 %v307_v21  ;;  %v301_v42 = vld [vmem:[%s528_s0 + $0x18] sm:$0xff]  }
   0x4   :  { %v362_v4 = vld [vmem:[%s532_s4] ss:$0 sm:$0xff]  ;;  %v269_v7 = vunpack.c.l.bf16 %v268_v3  ;;  %v270_v8 = vunpack.c.h.bf16 %v268_v3  ;;  %v62_v11 = vmul.f32 %v237_v2, %v354_v1  ;;  %v63_v13 = vmul.f32 %v238_v5, %v354_v1  ;;  %v308_v43 = vld [vmem:[%s531_s3 + $0x18] sm:$0xff]  }
   0x5   :  { %v367_v6 = vld [vmem:[%s530_s2] ss:$0 sm:$0xff]  ;;  %v64_v24 = vmul.f32 %v241_v14, %v354_v1  ;;  %v142_v25 = vmul.f32 %v273_v15, %v362_v4  ;;  %v65_v28 = vmul.f32 %v242_v18, %v354_v1  ;;  %v143_v29 = vmul.f32 %v274_v19, %v362_v4  ;;  %v303_v14 = vld [vmem:[%s528_s0 + $0x28] sm:$0xff]  }
   0x6   :  { %v379_v12 = vld [vmem:[%s533_s5] ss:$0 sm:$0xff]  ;;  %v140_v16 = vmul.f32 %v269_v7, %v362_v4  ;;  %v141_v17 = vmul.f32 %v270_v8, %v362_v4  ;;  %v85_v22 = vadd.f32 %v367_v6, %v62_v11  ;;  %v86_v23 = vadd.f32 %v367_v6, %v63_v13  ;;  %v310_v19 = vld [vmem:[%s531_s3 + $0x28] sm:$0xff]  }
   0x7   :  { %v87_v30 = vadd.f32 %v367_v6, %v64_v24  ;;  %v165_v31 = vadd.f32 %v379_v12, %v142_v25  ;;  %v88_v36 = vadd.f32 %v367_v6, %v65_v28  ;;  %v166_v37 = vadd.f32 %v379_v12, %v143_v29  ;;  %v302_v52 = vld [vmem:[%s528_s0 + $0x20] sm:$0xff]  }
   0x8   :  { %v163_v26 = vadd.f32 %v379_v12, %v140_v16  ;;  %v164_v27 = vadd.f32 %v379_v12, %v141_v17  ;;  %v66_v39 = vmul.f32 %v245_v32, %v354_v1  ;;  %v144_v40 = vmul.f32 %v277_v33, %v362_v4  ;;  %v309_v57 = vld [vmem:[%s531_s3 + $0x20] sm:$0xff]   ;;  %v304_v32 = vld [vmem:[%s528_s0 + $0x30] sm:$0xff]  }
   0x9   :  { %v181_v38 = vadd.f32 %v165_v31, %v87_v30  ;;  %v246_v41 = vunpack.c.h.bf16 %v300_v20  ;;  %v182_v46 = vadd.f32 %v166_v37, %v88_v36  ;;  %v278_v47 = vunpack.c.h.bf16 %v307_v21  ;;  %v311_v33 = vld [vmem:[%s531_s3 + $0x30] sm:$0xff]  }
   0xa   :  { %v179_v34 = vadd.f32 %v163_v26, %v85_v22  ;;  %v180_v35 = vadd.f32 %v164_v27, %v86_v23  ;;  %v89_v49 = vadd.f32 %v367_v6, %v66_v39  ;;  %v167_v50 = vadd.f32 %v379_v12, %v144_v40 }
   0xb   :  { %v197_v48 = vmax.f32 %v181_v38, 0.0  ;;  %v67_v51 = vmul.f32 %v246_v41, %v354_v1  ;;  %v198_v53 = vmax.f32 %v182_v46, 0.0  ;;  %v145_v54 = vmul.f32 %v278_v47, %v362_v4  ;;  %v305_v46 = vld [vmem:[%s528_s0 + $0x38] sm:$0xff]  }
   0xc   :  { %v195_v44 = vmax.f32 %v179_v34, 0.0  ;;  %v196_v45 = vmax.f32 %v180_v35, 0.0  ;;  %v249_v55 = vunpack.c.l.bf16 %v301_v42  ;;  %v281_v56 = vunpack.c.l.bf16 %v308_v43 }
   0xd   :  { %213 = vst [vmem:[%s534_s6 + $0x10] sm:$0xff] %v197_v48  ;;  %v183_v58 = vadd.f32 %v167_v50, %v89_v49  ;;  %v90_v59 = vadd.f32 %v367_v6, %v67_v51  ;;  %v250_v60 = vunpack.c.h.bf16 %v301_v42  ;;  %v282_v61 = vunpack.c.h.bf16 %v308_v43  ;;  %214 = vst [vmem:[%s534_s6 + $0x18] sm:$0xff] %v198_v53 }
   0xe   :  { %211 = vst [vmem:[%s534_s6] sm:$0xff] %v195_v44  ;;  %212 = vst [vmem:[%s534_s6 + $0x8] sm:$0xff] %v196_v45  ;;  %v168_v62 = vadd.f32 %v379_v12, %v145_v54  ;;  %v68_v63 = vmul.f32 %v249_v55, %v354_v1  ;;  %v146_v0 = vmul.f32 %v281_v56, %v362_v4  ;;  %v253_v2 = vunpack.c.l.bf16 %v302_v52  ;;  %v312_v55 = vld [vmem:[%s531_s3 + $0x38] sm:$0xff]  }
   0xf   :  { %v199_v3 = vmax.f32 %v183_v58, 0.0  ;;  %v69_v5 = vmul.f32 %v250_v60, %v354_v1  ;;  %v147_v7 = vmul.f32 %v282_v61, %v362_v4  ;;  %v285_v8 = vunpack.c.l.bf16 %v309_v57 }
  0x10   :  { %v184_v9 = vadd.f32 %v168_v62, %v90_v59  ;;  %v91_v10 = vadd.f32 %v367_v6, %v68_v63  ;;  %v169_v11 = vadd.f32 %v379_v12, %v146_v0  ;;  %v70_v13 = vmul.f32 %v253_v2, %v354_v1 }
  0x11   :  { %215 = vst [vmem:[%s534_s6 + $0x20] sm:$0xff] %v199_v3  ;;  %v92_v15 = vadd.f32 %v367_v6, %v69_v5  ;;  %v170_v16 = vadd.f32 %v379_v12, %v147_v7  ;;  %v148_v17 = vmul.f32 %v285_v8, %v362_v4  ;;  %v254_v18 = vunpack.c.h.bf16 %v302_v52 }
  0x12   :  { %v200_v20 = vmax.f32 %v184_v9, 0.0  ;;  %v185_v21 = vadd.f32 %v169_v11, %v91_v10  ;;  %v93_v22 = vadd.f32 %v367_v6, %v70_v13  ;;  %v286_v23 = vunpack.c.h.bf16 %v309_v57 }
  0x13   :  { %v186_v24 = vadd.f32 %v170_v16, %v92_v15  ;;  %v171_v25 = vadd.f32 %v379_v12, %v148_v17  ;;  %v71_v26 = vmul.f32 %v254_v18, %v354_v1  ;;  %v257_v27 = vunpack.c.l.bf16 %v303_v14 }
  0x14   :  { %216 = vst [vmem:[%s534_s6 + $0x28] sm:$0xff] %v200_v20  ;;  %v201_v28 = vmax.f32 %v185_v21, 0.0  ;;  %v149_v29 = vmul.f32 %v286_v23, %v362_v4  ;;  %v289_v30 = vunpack.c.l.bf16 %v310_v19  ;;  %v258_v31 = vunpack.c.h.bf16 %v303_v14 }
  0x15   :  { %v202_v34 = vmax.f32 %v186_v24, 0.0  ;;  %v187_v35 = vadd.f32 %v171_v25, %v93_v22  ;;  %v94_v36 = vadd.f32 %v367_v6, %v71_v26  ;;  %v72_v37 = vmul.f32 %v257_v27, %v354_v1 }
  0x16   :  { %217 = vst [vmem:[%s534_s6 + $0x30] sm:$0xff] %v201_v28  ;;  %v172_v38 = vadd.f32 %v379_v12, %v149_v29  ;;  %v150_v39 = vmul.f32 %v289_v30, %v362_v4  ;;  %v73_v40 = vmul.f32 %v258_v31, %v354_v1  ;;  %v290_v41 = vunpack.c.h.bf16 %v310_v19 }
  0x17   :  { %218 = vst [vmem:[%s534_s6 + $0x38] sm:$0xff] %v202_v34  ;;  %v203_v42 = vmax.f32 %v187_v35, 0.0  ;;  %v95_v43 = vadd.f32 %v367_v6, %v72_v37  ;;  %v261_v44 = vunpack.c.l.bf16 %v304_v32  ;;  %v293_v45 = vunpack.c.l.bf16 %v311_v33 }
  0x18   :  { %v188_v47 = vadd.f32 %v172_v38, %v94_v36  ;;  %v173_v48 = vadd.f32 %v379_v12, %v150_v39  ;;  %v96_v49 = vadd.f32 %v367_v6, %v73_v40  ;;  %v151_v50 = vmul.f32 %v290_v41, %v362_v4 }
  0x19   :  { %219 = vst [vmem:[%s534_s6 + $0x40] sm:$0xff] %v203_v42  ;;  %v74_v51 = vmul.f32 %v261_v44, %v354_v1  ;;  %v152_v52 = vmul.f32 %v293_v45, %v362_v4  ;;  %v262_v53 = vunpack.c.h.bf16 %v304_v32  ;;  %v294_v54 = vunpack.c.h.bf16 %v311_v33 }
  0x1a   :  { %v204_v56 = vmax.f32 %v188_v47, 0.0  ;;  %v189_v57 = vadd.f32 %v173_v48, %v95_v43  ;;  %v174_v58 = vadd.f32 %v379_v12, %v151_v50  ;;  %v265_v59 = vunpack.c.l.bf16 %v305_v46 }
  0x1b   :  { %v97_v60 = vadd.f32 %v367_v6, %v74_v51  ;;  %v175_v61 = vadd.f32 %v379_v12, %v152_v52  ;;  %v75_v62 = vmul.f32 %v262_v53, %v354_v1  ;;  %v153_v63 = vmul.f32 %v294_v54, %v362_v4 }
  0x1c   :  { %220 = vst [vmem:[%s534_s6 + $0x48] sm:$0xff] %v204_v56  ;;  %v205_v0 = vmax.f32 %v189_v57, 0.0  ;;  %v190_v2 = vadd.f32 %v174_v58, %v96_v49  ;;  %v76_v3 = vmul.f32 %v265_v59, %v354_v1  ;;  %v297_v5 = vunpack.c.l.bf16 %v312_v55 }
  0x1d   :  { %v191_v7 = vadd.f32 %v175_v61, %v97_v60  ;;  %v98_v8 = vadd.f32 %v367_v6, %v75_v62  ;;  %v176_v9 = vadd.f32 %v379_v12, %v153_v63  ;;  %v266_v10 = vunpack.c.h.bf16 %v305_v46 }
  0x1e   :  { %221 = vst [vmem:[%s534_s6 + $0x50] sm:$0xff] %v205_v0  ;;  %v206_v11 = vmax.f32 %v190_v2, 0.0  ;;  %v99_v13 = vadd.f32 %v367_v6, %v76_v3  ;;  %v154_v14 = vmul.f32 %v297_v5, %v362_v4  ;;  %v298_v15 = vunpack.c.h.bf16 %v312_v55 }
  0x1f   :  { %v207_v16 = vmax.f32 %v191_v7, 0.0  ;;  %v192_v17 = vadd.f32 %v176_v9, %v98_v8  ;;  %v77_v18 = vmul.f32 %v266_v10, %v354_v1 }
  0x20   :  { %222 = vst [vmem:[%s534_s6 + $0x58] sm:$0xff] %v206_v11  ;;  %v177_v19 = vadd.f32 %v379_v12, %v154_v14  ;;  %v155_v20 = vmul.f32 %v298_v15, %v362_v4 }
  0x21   :  { %223 = vst [vmem:[%s534_s6 + $0x60] sm:$0xff] %v207_v16  ;;  %v208_v21 = vmax.f32 %v192_v17, 0.0  ;;  %v100_v22 = vadd.f32 %v367_v6, %v77_v18 }
  0x22   :  { %v193_v23 = vadd.f32 %v177_v19, %v99_v13  ;;  %v178_v24 = vadd.f32 %v379_v12, %v155_v20 }
  0x23   :  { %224 = vst [vmem:[%s534_s6 + $0x68] sm:$0xff] %v208_v21 }
  0x24   :  { %v209_v1 = vmax.f32 %v193_v23, 0.0  ;;  %v194_v25 = vadd.f32 %v178_v24, %v100_v22 }
  0x26   :  { %225 = vst [vmem:[%s534_s6 + $0x70] sm:$0xff] %v209_v1  ;;  %v210_v4 = vmax.f32 %v194_v25, 0.0 }
  0x28   :  { %226 = vst [vmem:[%s534_s6 + $0x78] sm:$0xff] %v210_v4 }

// kernel: basic_block_forward.6
= control target key start
LH: loop header
LB: loop body
LE: loop exit
PB: predicated region body
PF: predicated region fallthrough
CT: control target
= control target key end

     0   :  { %vm97_vm0 = vcmask 1041408   ;;  %vm72_vm1 = vcmask 31744   ;;  %s574_s1 = inlined_call_operand.vmem [shape: bf16[4,128], index: 1, kind: input, shape index: {}]   ;;  %s575_s0 = inlined_call_operand.vmem [shape: bf16[128,4], index: 0, kind: input, shape index: {}]   ;;  %s576_s2 = inlined_call_operand.vmem [shape: bf16[128,128], index: 2, kind: output, shape index: {0}]   ;;  %s577_s3 = inlined_call_operand.vmem [shape: f32[1,1,128], index: 3, kind: output, shape index: {1}]   ;;  %s578_s4 = inlined_call_operand.vmem [shape: f32[1,1,128], index: 4, kind: output, shape index: {2}]  }
   0x1   :  { %v31_v0 = vld [vmem:[%s574_s1] sm:$0x3]  ;;  %v477_v3 = vld [vmem:[%s575_s0 + $0x8] sm:$0xff]   ;;  %v478_v4 = vld [vmem:[%s575_s0 + $0x10] sm:$0xff]  }
   0x2   :  { %474 = vmatprep.subr.msk.bf16.mxu0 %vm97_vm0, %v31_v0  ;;  %v99_v1 = vsel %vm97_vm0, %v31_v0, 0  ;;  %v476_v2 = vld [vmem:[%s575_s0] sm:$0xff]   ;;  %475 = vmatprep.subr.msk.bf16.mxu1 %vm97_vm0, %v31_v0  ;;  %v481_v6 = vld [vmem:[%s575_s0 + $0x28] sm:$0xff]   ;;  %v482_v7 = vld [vmem:[%s575_s0 + $0x30] sm:$0xff]  }
   0x3   :  { %455 = vmatpush3.bf16.msra.mxu0 %v99_v1  ;;  %473 = vmatpush3.bf16.msra.mxu1 %v99_v1  ;;  %v480_v5 = vld [vmem:[%s575_s0 + $0x20] sm:$0xff]   ;;  %v479_v8 = vld [vmem:[%s575_s0 + $0x18] sm:$0xff]  }
   0x4   :  { %456 = vmatprep.mubr.msk.bf16.mxu0 %vm72_vm1, %v476_v2  ;;  %464 = vmatprep.mubr.msk.bf16.mxu1 %vm72_vm1, %v480_v5  ;;  %v483_v9 = vld [vmem:[%s575_s0 + $0x38] sm:$0xff]  }
   0x6   :  { %457 = vmatmul.mubr.msk.bf16.vlgmr.msra.gmra.mxu0 %vm72_vm1, %v477_v3  ;;  %465 = vmatmul.mubr.msk.bf16.vlgmr.msra.gmra.mxu1 %vm72_vm1, %v481_v6 }
   0x7   :  { %460 = vmatprep.mubr.msk.bf16.mxu0 %vm72_vm1, %v478_v4  ;;  %468 = vmatprep.mubr.msk.bf16.mxu1 %vm72_vm1, %v482_v7 }
   0xe   :  { %461 = vmatmul.mubr.msk.bf16.gmra.mxu0 %vm72_vm1, %v479_v8  ;;  %469 = vmatmul.mubr.msk.bf16.gmra.mxu1 %vm72_vm1, %v483_v9 }
  0xc6   :  { %v458_v10 = vpop.f32.mrf.mxu0  ;;  %v466_v12 = vpop.f32.mrf.mxu1 }
  0xc7   :  { %v302_v24 = vmul.f32 %v458_v10, %v458_v10  ;;  %v310_v61 = vmul.f32 %v466_v12, %v466_v12 }
  0xc8   :  { %v135_v11 = vpop.f32.mrf.mxu0  ;;  %v167_v15 = vpop.f32.mrf.mxu1 }
  0xc9   :  { %v300_v17 = vmul.f32 %v135_v11, %v135_v11  ;;  %v308_v55 = vmul.f32 %v167_v15, %v167_v15 }
  0xca   :  { %v459_v13 = vpop.f32.mrf.mxu0  ;;  %v467_v21 = vpop.f32.mrf.mxu1 }
  0xcb   :  { %v406_v14 = vpack.c.bf16 %v459_v13, %v458_v10  ;;  %v426_v23 = vpack.c.bf16 %v467_v21, %v466_v12  ;;  %v303_v30 = vmul.f32 %v459_v13, %v459_v13  ;;  %v311_v0 = vmul.f32 %v467_v21, %v467_v21 }
  0xcc   :  { %v138_v16 = vpop.f32.mrf.mxu0  ;;  %v170_v27 = vpop.f32.mrf.mxu1 }
  0xcd   :  { %438 = vst [vmem:[%s576_s2 + $0x8] sm:$0xff] %v406_v14   ;;  %v401_v18 = vpack.c.bf16 %v138_v16, %v135_v11  ;;  %v278_v19 = vadd.f32 %v138_v16, %v135_v11  ;;  %v301_v20 = vmul.f32 %v138_v16, %v138_v16  ;;  %442 = vst [vmem:[%s576_s2 + $0x28] sm:$0xff] %v426_v23  }
  0xce   :  { %v462_v22 = vpop.f32.mrf.mxu0  ;;  %v421_v29 = vpack.c.bf16 %v170_v27, %v167_v15  ;;  %v470_v33 = vpop.f32.mrf.mxu1  ;;  %v309_v59 = vmul.f32 %v170_v27, %v170_v27 }
  0xcf   :  { %402 = vst [vmem:[%s576_s2] sm:$0xff] %v401_v18   ;;  %v279_v25 = vadd.f32 %v458_v10, %v278_v19  ;;  %v316_v26 = vadd.f32 %v301_v20, %v300_v17  ;;  %v306_v47 = vmul.f32 %v462_v22, %v462_v22  ;;  %v314_v9 = vmul.f32 %v470_v33, %v470_v33 }
  0xd0   :  { %v151_v28 = vpop.f32.mrf.mxu0  ;;  %441 = vst [vmem:[%s576_s2 + $0x20] sm:$0xff] %v421_v29   ;;  %v183_v39 = vpop.f32.mrf.mxu1 }
  0xd1   :  { %v317_v31 = vadd.f32 %v316_v26, %v302_v24  ;;  %v280_v32 = vadd.f32 %v459_v13, %v279_v25  ;;  %v304_v36 = vmul.f32 %v151_v28, %v151_v28  ;;  %v312_v4 = vmul.f32 %v183_v39, %v183_v39 }
  0xd2   :  { %v463_v34 = vpop.f32.mrf.mxu0  ;;  %v471_v45 = vpop.f32.mrf.mxu1 }
  0xd3   :  { %v281_v35 = vadd.f32 %v280_v32, %v151_v28  ;;  %v318_v37 = vadd.f32 %v317_v31, %v303_v30  ;;  %v416_v38 = vpack.c.bf16 %v463_v34, %v462_v22  ;;  %v436_v46 = vpack.c.bf16 %v471_v45, %v470_v33 }
  0xd4   :  { %v154_v40 = vpop.f32.mrf.mxu0  ;;  %v186_v50 = vpop.f32.mrf.mxu1  ;;  %v307_v52 = vmul.f32 %v463_v34, %v463_v34  ;;  %v315_v13 = vmul.f32 %v471_v45, %v471_v45 }
  0xd5   :  { %v319_v41 = vadd.f32 %v318_v37, %v304_v36  ;;  %440 = vst [vmem:[%s576_s2 + $0x18] sm:$0xff] %v416_v38   ;;  %v411_v42 = vpack.c.bf16 %v154_v40, %v151_v28  ;;  %v282_v43 = vadd.f32 %v281_v35, %v154_v40  ;;  %v305_v44 = vmul.f32 %v154_v40, %v154_v40 }
  0xd6   :  { %444 = vst [vmem:[%s576_s2 + $0x38] sm:$0xff] %v436_v46   ;;  %v431_v51 = vpack.c.bf16 %v186_v50, %v183_v39  ;;  %v313_v8 = vmul.f32 %v186_v50, %v186_v50 }
  0xd7   :  { %439 = vst [vmem:[%s576_s2 + $0x10] sm:$0xff] %v411_v42   ;;  %v283_v48 = vadd.f32 %v462_v22, %v282_v43  ;;  %v320_v49 = vadd.f32 %v319_v41, %v305_v44 }
  0xd8   :  { %443 = vst [vmem:[%s576_s2 + $0x30] sm:$0xff] %v431_v51  }
  0xd9   :  { %v284_v53 = vadd.f32 %v463_v34, %v283_v48  ;;  %v321_v54 = vadd.f32 %v320_v49, %v306_v47 }
  0xdb   :  { %v322_v56 = vadd.f32 %v321_v54, %v307_v52  ;;  %v285_v57 = vadd.f32 %v284_v53, %v167_v15 }
  0xdd   :  { %v286_v58 = vadd.f32 %v285_v57, %v170_v27  ;;  %v323_v60 = vadd.f32 %v322_v56, %v308_v55 }
  0xdf   :  { %v287_v62 = vadd.f32 %v466_v12, %v286_v58  ;;  %v324_v63 = vadd.f32 %v323_v60, %v309_v59 }
  0xe1   :  { %v325_v1 = vadd.f32 %v324_v63, %v310_v61  ;;  %v288_v2 = vadd.f32 %v467_v21, %v287_v62 }
  0xe3   :  { %v289_v3 = vadd.f32 %v288_v2, %v183_v39  ;;  %v326_v5 = vadd.f32 %v325_v1, %v311_v0 }
  0xe5   :  { %v327_v6 = vadd.f32 %v326_v5, %v312_v4  ;;  %v290_v7 = vadd.f32 %v289_v3, %v186_v50 }
  0xe7   :  { %v291_v10 = vadd.f32 %v470_v33, %v290_v7  ;;  %v328_v11 = vadd.f32 %v327_v6, %v313_v8 }
  0xe9   :  { %v292_v14 = vadd.f32 %v471_v45, %v291_v10  ;;  %v329_v15 = vadd.f32 %v328_v11, %v314_v9 }
  0xeb   :  { %v293_v16 = vrot.slane %v292_v14, 4  ;;  %v330_v17 = vadd.f32 %v329_v15, %v315_v13 }
  0xed   :  { %v294_v18 = vadd.f32 %v293_v16, %v292_v14  ;;  %v331_v12 = vrot.slane %v330_v17, 4 }
  0xef   :  { %v295_v19 = vrot.slane %v294_v18, 2  ;;  %v332_v20 = vadd.f32 %v331_v12, %v330_v17 }
  0xf1   :  { %v296_v22 = vadd.f32 %v295_v19, %v294_v18  ;;  %v333_v21 = vrot.slane %v332_v20, 2 }
  0xf3   :  { %v297_v23 = vrot.slane %v296_v22, 1  ;;  %v334_v24 = vadd.f32 %v333_v21, %v332_v20 }
  0xf5   :  { %v298_v25 = vadd.f32 %v297_v23, %v296_v22  ;;  %v335_v26 = vrot.slane %v334_v24, 1 }
  0xf7   :  { %299 = vst [vmem:[%s577_s3] sm:$0x1] %v298_v25  ;;  %v336_v27 = vadd.f32 %v335_v26, %v334_v24 }
  0xf9   :  { %337 = vst [vmem:[%s578_s4] sm:$0x1] %v336_v27 }

// kernel: basic_block_forward.5
= control target key start
LH: loop header
LB: loop body
LE: loop exit
PB: predicated region body
PF: predicated region fallthrough
CT: control target
= control target key end

     0   :  { %s3486_s21 = smov 0   ;;  %s4197_s0 = inlined_call_operand.vmem [shape: bf16[2,8,8,128], index: 0, kind: input, shape index: {}]   ;;  %s4198_s1 = inlined_call_operand.vmem [shape: f32[1,128], index: 1, kind: input, shape index: {}]   ;;  %s4199_s2 = inlined_call_operand.vmem [shape: f32[1,128], index: 2, kind: input, shape index: {}]   ;;  %s4200_s3 = inlined_call_operand.vmem [shape: bf16[9,128,128], index: 3, kind: input, shape index: {}]   ;;  %s4201_s4 = inlined_call_operand.vmem [shape: bf16[2,64,128], index: 4, kind: output, shape index: {0}]   ;;  %s4202_s5 = inlined_call_operand.vmem [shape: f32[2,1,128], index: 5, kind: output, shape index: {1}]   ;;  %s4203_s6 = inlined_call_operand.vmem [shape: f32[2,1,128], index: 6, kind: output, shape index: {2}]  }
   0x1 LB: > { %s2660_s22 = sadd.s32 4294967295, %s3448_s21   ;;  %p2664_p0 = scmp.ge.s32.totalorder %s3448_s21, 1  ;;  %s3448_s21 = sphi %s3486_s21, %s17_s21  }
   0x2   : > { %p217_p1 = scmp.lt.s32.totalorder %s3448_s21, 3 }
   0x4   : > { %p218_p2 = pnand %p2664_p0, %p217_p1 }
   0x6   : > { %221 = sbr.rel (%p218_p2) target bundleno = 414 (0x19e), region = 36 }
   0xb   : > { %v3358_v0 = vld [vmem:[%s4200_s3 + $0x38] sm:$0xff]   ;;  %p3499_p3 = scmp.lt.s32.totalorder %s2660_s22, 1  ;;  %v3359_v1 = vld [vmem:[%s4200_s3 + $0x30] sm:$0xff]   ;;  %v3450_v3 = vmov 0   ;;  %v3361_v4 = vld [vmem:[%s4200_s3 + $0x28] sm:$0xff]   ;;  %vm457_vm0 = vcmask 1043456  }
   0xc   : > { %3141 = vmatprep.subr.bf16.mxu1 %v3358_v0  ;;  %v3360_v2 = vld [vmem:[%s4200_s3 + $0x78] sm:$0xff]   ;;  %270 = vst [vmem:[#allocation2] sm:$0xf] %v3450_v3  ;;  %272 = vst [vmem:[#allocation2 + $0x8] sm:$0xf] %v3450_v3  ;;  %v3362_v5 = vld [vmem:[%s4200_s3 + $0x70] sm:$0xff]  }
   0xd   : > { %271 = vst [vmem:[#allocation2 + $0x4] sm:$0x1] %v3450_v3  ;;  %273 = vst [vmem:[#allocation2 + $0xc] sm:$0x1] %v3450_v3  ;;  %3142 = vmatpush3.bf16.msra.mxu1 %v3358_v0  ;;  %3117 = vmatprep.subr.bf16.mxu0 %v3360_v2  ;;  %s4234_s22 = smov (!%p3499_p3, %s2660_s22), 1  ;;  %v3364_v6 = vld [vmem:[%s4200_s3 + $0x68] sm:$0xff]  }
   0xe   : > { %274 = vst [vmem:[#allocation2 + $0x10] sm:$0xf] %v3450_v3  ;;  %275 = vst [vmem:[#allocation2 + $0x14] sm:$0x1] %v3450_v3  ;;  %3143 = vmatprep.subr.bf16.mxu1 %v3359_v1  ;;  %3118 = vmatpush3.bf16.msra.mxu0 %v3360_v2  ;;  %v3363_v7 = vld [vmem:[%s4200_s3 + $0x20] sm:$0xff]   ;;  %s2949_s14 = sshll.u32 %s4234_s22, 5  ;;  %s265_s8 = scalar_lea.vmem %s4202_s5, %s4234_s22 }
   0xf   : > { %276 = vst [vmem:[#allocation2 + $0x18] sm:$0xf] %v3450_v3  ;;  %277 = vst [vmem:[#allocation2 + $0x1c] sm:$0x1] %v3450_v3  ;;  %3119 = vmatprep.subr.bf16.mxu0 %v3362_v5  ;;  %v3366_v8 = vld [vmem:[%s4200_s3 + $0x60] sm:$0xff]   ;;  %v3365_v9 = vld [vmem:[%s4200_s3 + $0x18] sm:$0xff]   ;;  %s3539_s23 = scalar_lea.vmem %s4197_s0, %s2949_s14  ;;  %s4171_s30 = scalar_lea.vmem %s4201_s4, %s2949_s14 }
  0x10   : > { %278 = vst [vmem:[#allocation2 + $0x20] sm:$0xf] %v3450_v3  ;;  %279 = vst [vmem:[#allocation2 + $0x24] sm:$0x1] %v3450_v3  ;;  %v3368_v10 = vld [vmem:[%s4200_s3 + $0x58] sm:$0xff]   ;;  %v2968_v11 = vld [vmem:[%s3539_s23] sm:$0xff]   ;;  %s268_s11 = scalar_lea.vmem %s4203_s6, %s4234_s22 }
  0x11   : > { %280 = vst [vmem:[#allocation2 + $0x28] sm:$0xf] %v3450_v3  ;;  %281 = vst [vmem:[#allocation2 + $0x2c] sm:$0x1] %v3450_v3  ;;  %3144 = vmatpush3.bf16.msra.mxu1 %v3359_v1  ;;  %v3548_v12 = vld [vmem:[%s4198_s1] ss:$0 sm:$0xff]  ;;  %v2969_v14 = vunpack.c.l.bf16 %v2968_v11  ;;  %v2970_v15 = vunpack.c.h.bf16 %v2968_v11 }
  0x12   : > { %282 = vst [vmem:[#allocation2 + $0x30] sm:$0xf] %v3450_v3  ;;  %283 = vst [vmem:[#allocation2 + $0x34] sm:$0x1] %v3450_v3  ;;  %3145 = vmatprep.subr.bf16.mxu1 %v3361_v4  ;;  %3120 = vmatpush3.bf16.msra.mxu0 %v3362_v5  ;;  %v3367_v13 = vld [vmem:[%s4200_s3 + $0x10] sm:$0xff]   ;;  %v3003_v20 = vld [vmem:[%s3539_s23 + $0x8] sm:$0xff]  }
  0x13   : > { %284 = vst [vmem:[#allocation2 + $0x38] sm:$0xf] %v3450_v3  ;;  %285 = vst [vmem:[#allocation2 + $0x3c] sm:$0x1] %v3450_v3  ;;  %3121 = vmatprep.subr.bf16.mxu0 %v3364_v6  ;;  %v3556_v16 = vld [vmem:[%s4199_s2] ss:$0 sm:$0xff]  ;;  %v314_v19 = vmul.f32 %v2969_v14, %v3548_v12  ;;  %v315_v21 = vmul.f32 %v2970_v15, %v3548_v12  ;;  %v2973_v22 = vunpack.c.l.bf16 %v3003_v20  ;;  %v2974_v29 = vunpack.c.h.bf16 %v3003_v20 }
  0x14   : > { %286 = vst [vmem:[#allocation2 + $0x40] sm:$0xf] %v3450_v3  ;;  %287 = vst [vmem:[#allocation2 + $0x44] sm:$0x1] %v3450_v3  ;;  %v3558_v17 = vld [vmem:[#allocation2] sm:$0xf] }
  0x15   : > { %288 = vst [vmem:[#allocation2 + $0x48] sm:$0xf] %v3450_v3  ;;  %289 = vst [vmem:[#allocation2 + $0x4c] sm:$0x1] %v3450_v3  ;;  %3146 = vmatpush3.bf16.msra.mxu1 %v3361_v4  ;;  %v3370_v18 = vld [vmem:[%s4200_s3 + $0x50] sm:$0xff]   ;;  %v3369_v23 = vld [vmem:[%s4200_s3 + $0x8] sm:$0xff]   ;;  %v328_v24 = vadd.f32 %v3556_v16, %v314_v19  ;;  %v329_v26 = vadd.f32 %v3556_v16, %v315_v21  ;;  %v316_v28 = vmul.f32 %v2973_v22, %v3548_v12 }
  0x16   : > { %3147 = vmatprep.subr.bf16.mxu1 %v3363_v7  ;;  %3122 = vmatpush3.bf16.msra.mxu0 %v3364_v6  ;;  %v547_v25 = vshrl.u32 %v3558_v17, 16  ;;  %v550_v27 = vshll.u32 %v3558_v17, 16  ;;  %v3372_v30 = vld [vmem:[%s4200_s3 + $0x48] sm:$0xff]   ;;  %vm458_vm1 = vsmask.f32 7938  ;;  %vm463_vm2 = vcmask 1040384  }
  0x17   : > { %3123 = vmatprep.subr.bf16.mxu0 %v3366_v8  ;;  %v336_v31 = vmax.f32 %v328_v24, 0.0  ;;  %v337_v32 = vmax.f32 %v329_v26, 0.0  ;;  %v330_v33 = vadd.f32 %v3556_v16, %v316_v28  ;;  %v3371_v34 = vld [vmem:[%s4200_s3] sm:$0xff]   ;;  %vm464_vm3 = vsmask.f32 256  ;;  %v3587_v43 = vld [vmem:[%s4200_s3 + $0xf8] sm:$0xff]   ;;  %vm3596_vm4 = vmand %vm457_vm0, %vm458_vm1 }
  0x18   : > { %v3581_v36 = vrot.slane %v547_v25, 4  ;;  %v552_v38 = vrot.slane %v550_v27, 5  ;;  %v317_v40 = vmul.f32 %v2974_v29, %v3548_v12  ;;  %v3376_v46 = vld [vmem:[%s4200_s3 + $0x40] sm:$0xff]   ;;  %v460_v47 = vld [vmem:[#allocation2 + $0x8] sm:$0xf]  ;;  %v3603_v55 = vld [vmem:[%s4200_s3 + $0xb8] sm:$0xff]  }
  0x19   : > { %3148 = vmatpush3.bf16.msra.mxu1 %v3363_v7  ;;  %v2951_v35 = vpack.c.bf16 %v336_v31, %v336_v31  ;;  %v2952_v37 = vpack.c.bf16 %v337_v32, %v337_v32  ;;  %v338_v39 = vmax.f32 %v330_v33, 0.0  ;;  %v469_v49 = vld [vmem:[#allocation2 + $0x10] sm:$0xf]  ;;  %v466_v50 = vld [vmem:[#allocation2 + $0xc] sm:$0x1]  ;;  %vm3607_vm5 = vmand %vm463_vm2, %vm464_vm3  ;;  %vm965_vm9 = vcmask 1042432  }
  0x1a   : > { %3149 = vmatprep.subr.bf16.mxu1 %v3365_v9  ;;  %3124 = vmatpush3.bf16.msra.mxu0 %v3366_v8  ;;  %v3592_v51 = vld [vmem:[#allocation2 + $0x4] sm:$0x1]  ;;  %v472_v59 = vld [vmem:[#allocation2 + $0x14] sm:$0x1]  ;;  %v331_v60 = vadd.f32 %v3556_v16, %v317_v40  ;;  %v475_v1 = vld [vmem:[#allocation2 + $0x18] sm:$0xf]  ;;  %v553_v3 = vor.u32 %v552_v38, %v3581_v36 }
  0x1b   : > { %3125 = vmatprep.subr.bf16.mxu0 %v3368_v10  ;;  %v377_v41 = vshrl.u32 %v2951_v35, 16  ;;  %v380_v42 = vshll.u32 %v2951_v35, 16  ;;  %v385_v44 = vshrl.u32 %v2952_v37, 16  ;;  %v388_v45 = vshll.u32 %v2952_v37, 16  ;;  %v3639_v26 = vld [vmem:[%s3539_s23 + $0x18] sm:$0xff]   ;;  %v3401_v53 = vld [vmem:[%s4200_s3 + $0x160] sm:$0xff]  }
  0x1c   : > { %v2953_v48 = vpack.c.bf16 %v338_v39, %v338_v39  ;;  %v556_v4 = vshll.u32 %v3592_v51, 16  ;;  %vm543_vm6 = vsmask.f32 3328  ;;  %vm544_vm7 = vsmask.f32 7440  ;;  %v3435_v24 = vld [vmem:[%s4200_s3 + $0x220] sm:$0xff]  }
  0x1d   : > { %3150 = vmatpush3.bf16.msra.mxu1 %v3365_v9  ;;  %v379_v52 = vrot.slane %v377_v41, 7  ;;  %v387_v54 = vrot.slane %v385_v44, 7  ;;  %v478_v9 = vld [vmem:[#allocation2 + $0x1c] sm:$0x1]  ;;  %v339_v14 = vmax.f32 %v331_v60, 0.0  ;;  %v3629_v21 = vrot.slane %v553_v3, 4  ;;  %vm3633_vm8 = vmor %vm543_vm6, %vm544_vm7 }
  0x1e   : > { %3151 = vmatprep.subr.bf16.mxu1 %v3367_v13  ;;  %3126 = vmatpush3.bf16.msra.mxu0 %v3368_v10  ;;  %v393_v56 = vshrl.u32 %v2953_v48, 16  ;;  %v396_v57 = vshll.u32 %v2953_v48, 16  ;;  %v3631_v22 = vrot.slane %v556_v4, 5  ;;  %v970_v28 = vrot.slane %v3592_v51, 5 }
  0x1f   : > { %3127 = vmatprep.subr.bf16.mxu0 %v3370_v18  ;;  %v382_v61 = vor.u32 %v380_v42, %v379_v52  ;;  %v383_v62 = vrot.slane %v379_v52, 4  ;;  %v390_v63 = vor.u32 %v388_v45, %v387_v54  ;;  %v391_v0 = vrot.slane %v387_v54, 4 }
  0x20   : > { %v395_v2 = vrot.slane %v393_v56, 7  ;;  %vm966_vm10 = vcmask 1046532  }
  0x21   : > { %3152 = vmatpush3.bf16.msra.mxu1 %v3367_v13  ;;  %v461_v5 = vsel %vm3596_vm4, %v382_v61, %v460_v47  ;;  %v470_v6 = vsel %vm3596_vm4, %v390_v63, %v469_v49  ;;  %v467_v7 = vsel %vm3607_vm5, %v383_v62, %v466_v50  ;;  %v473_v8 = vsel %vm3607_vm5, %v391_v0, %v472_v59  ;;  %v3004_v13 = vld [vmem:[%s3539_s23 + $0x10] sm:$0xff]   ;;  %vm3756_vm11 = vmor %vm965_vm9, %vm966_vm10 }
  0x22   : > { %3153 = vmatprep.subr.bf16.mxu1 %v3369_v23  ;;  %3128 = vmatpush3.bf16.msra.mxu0 %v3370_v18  ;;  %462 = vst [vmem:[#allocation2 + $0x8] sm:$0xf] %v461_v5  ;;  %v398_v10 = vor.u32 %v396_v57, %v395_v2  ;;  %v399_v11 = vrot.slane %v395_v2, 4  ;;  %471 = vst [vmem:[#allocation2 + $0x10] sm:$0xf] %v470_v6  ;;  %v2977_v19 = vunpack.c.l.bf16 %v3004_v13  ;;  %v2978_v20 = vunpack.c.h.bf16 %v3004_v13  ;;  %v3377_v57 = vld [vmem:[%s4200_s3 + $0xf0] sm:$0xff]  }
  0x23   : > { %3129 = vmatprep.subr.bf16.mxu0 %v3372_v30  ;;  %468 = vst [vmem:[#allocation2 + $0xc] sm:$0x1] %v467_v7  ;;  %474 = vst [vmem:[#allocation2 + $0x14] sm:$0x1] %v473_v8  ;;  %v3379_v2 = vld [vmem:[%s4200_s3 + $0xe8] sm:$0xff]  }
  0x24   : > { %v476_v15 = vsel %vm3596_vm4, %v398_v10, %v475_v1  ;;  %v479_v18 = vsel %vm3607_vm5, %v399_v11, %v478_v9  ;;  %v318_v25 = vmul.f32 %v2977_v19, %v3548_v12  ;;  %v319_v27 = vmul.f32 %v2978_v20, %v3548_v12  ;;  %v481_v5 = vld [vmem:[#allocation2 + $0x20] sm:$0xf] }
  0x25   : > { %3154 = vmatpush3.bf16.msra.mxu1 %v3369_v23  ;;  %477 = vst [vmem:[#allocation2 + $0x18] sm:$0xf] %v476_v15  ;;  %480 = vst [vmem:[#allocation2 + $0x1c] sm:$0x1] %v479_v18  ;;  %v2954_v23 = vpack.c.bf16 %v339_v14, %v339_v14 }
  0x26   : > { %3155 = vmatprep.subr.bf16.mxu1 %v3371_v34  ;;  %3130 = vmatpush3.bf16.msra.mxu0 %v3372_v30  ;;  %v2981_v30 = vunpack.c.l.bf16 %v3639_v26  ;;  %v332_v35 = vadd.f32 %v3556_v16, %v318_v25  ;;  %v333_v45 = vadd.f32 %v3556_v16, %v319_v27  ;;  %v3381_v25 = vld [vmem:[%s4200_s3 + $0xe0] sm:$0xff]  }
  0x27   : > { %3131 = vmatprep.subr.bf16.mxu0 %v3376_v46  ;;  %v401_v29 = vshrl.u32 %v2954_v23, 16  ;;  %v404_v63 = vshll.u32 %v2954_v23, 16 }
  0x28   : > { %v320_v50 = vmul.f32 %v2981_v30, %v3548_v12  ;;  %v340_v8 = vmax.f32 %v332_v35, 0.0  ;;  %v341_v14 = vmax.f32 %v333_v45, 0.0 }
  0x29   : > { %3156 = vmatpush3.bf16.msra.mxu1 %v3371_v34  ;;  %v512_v31 = vld [vmem:[#allocation2 + $0x8] sm:$0xf]  ;;  %v513_v32 = vld [vmem:[#allocation2 + $0x10] sm:$0xf]  ;;  %v559_v34 = vsel %vm3633_vm8, %v3629_v21, %v3631_v22  ;;  %v403_v9 = vrot.slane %v401_v29, 7 }
  0x2a   : > { %3189 = vmatprep.subr.bf16.mxu1 %v3587_v43  ;;  %3132 = vmatpush3.bf16.msra.mxu0 %v3376_v46  ;;  %v3644_v33 = vld [vmem:[#allocation2 + $0xc] sm:$0x1]  ;;  %v561_v36 = vshrl.u32 %v512_v31, 16  ;;  %v564_v37 = vshll.u32 %v512_v31, 16  ;;  %v2707_v38 = vcombine.low %v3558_v17, %v512_v31  ;;  %v575_v39 = vshrl.u32 %v513_v32, 16 }
  0x2b   : > { %3165 = vmatprep.subr.bf16.mxu0 %v3603_v55  ;;  %v3652_v40 = vld [vmem:[#allocation2 + $0x14] sm:$0x1]  ;;  %v578_v41 = vshll.u32 %v513_v32, 16  ;;  %v570_v42 = vshll.u32 %v3644_v33, 16  ;;  %v334_v13 = vadd.f32 %v3556_v16, %v320_v50  ;;  %v2955_v18 = vpack.c.bf16 %v340_v8, %v340_v8  ;;  %v484_v21 = vld [vmem:[#allocation2 + $0x24] sm:$0x1] }
  0x2c   : > { %v584_v44 = vshll.u32 %v3652_v40, 16  ;;  %v563_v46 = vrot.slane %v561_v36, 4  ;;  %v566_v47 = vrot.slane %v564_v37, 5  ;;  %3157 = vmatprep.mubr.bf16.mxu1 %v2707_v38  ;;  %v514_v48 = vld [vmem:[#allocation2 + $0x18] sm:$0xf]  ;;  %v577_v49 = vrot.slane %v575_v39, 4 }
  0x2d   : > { %v580_v52 = vrot.slane %v578_v41, 5  ;;  %v589_v54 = vshrl.u32 %v514_v48, 16  ;;  %v592_v17 = vshll.u32 %v514_v48, 16  ;;  %v2708_v56 = vcombine.low %v513_v32, %v514_v48  ;;  %v3661_v59 = vld [vmem:[#allocation2 + $0x1c] sm:$0x1]  ;;  %v3380_v38 = vld [vmem:[%s4200_s3 + $0xb0] sm:$0xff]  }
  0x2e   : > { %v567_v60 = vor.u32 %v566_v47, %v563_v46  ;;  %v572_v61 = vrot.slane %v570_v42, 5  ;;  %v598_v62 = vshll.u32 %v3661_v59, 16  ;;  %v586_v4 = vrot.slane %v584_v44, 5  ;;  %v487_v41 = vld [vmem:[#allocation2 + $0x28] sm:$0xf] }
  0x2f   : > { %v591_v0 = vrot.slane %v589_v54, 4  ;;  %v594_v1 = vrot.slane %v592_v17, 5  ;;  %3158 = vmatmul.mubr.bf16.vlgmr.msra.gmra.mxu1 %v2708_v56  ;;  %v581_v3 = vor.u32 %v580_v52, %v577_v49  ;;  %v406_v19 = vor.u32 %v404_v63, %v403_v9  ;;  %v493_v47 = vld [vmem:[#allocation2 + $0x30] sm:$0xf]  ;;  %v490_v48 = vld [vmem:[#allocation2 + $0x2c] sm:$0x1] }
  0x30   : > { %3190 = vmatpush3.bf16.msra.mxu1 %v3587_v43  ;;  %v568_v6 = vrot.slane %v567_v60, 4  ;;  %v600_v7 = vrot.slane %v598_v62, 5  ;;  %v407_v20 = vrot.slane %v403_v9, 4  ;;  %v342_v27 = vmax.f32 %v334_v13, 0.0  ;;  %v499_v17 = vld [vmem:[#allocation2 + $0x38] sm:$0xf] }
  0x31   : > { %3191 = vmatprep.subr.bf16.mxu1 %v3377_v57  ;;  %v582_v10 = vrot.slane %v581_v3, 4  ;;  %v595_v11 = vor.u32 %v594_v1, %v591_v0  ;;  %v409_v29 = vshrl.u32 %v2955_v18, 16  ;;  %v412_v30 = vshll.u32 %v2955_v18, 16  ;;  %v496_v56 = vld [vmem:[#allocation2 + $0x34] sm:$0x1] }
  0x32   : > { %v573_v15 = vsel %vm3633_vm8, %v568_v6, %v572_v61  ;;  %v482_v31 = vsel %vm3596_vm4, %v406_v19, %v481_v5  ;;  %v2956_v32 = vpack.c.bf16 %v341_v14, %v341_v14  ;;  %v2957_v35 = vpack.c.bf16 %v342_v27, %v342_v27  ;;  %v502_v61 = vld [vmem:[#allocation2 + $0x3c] sm:$0x1]  ;;  %v3701_v5 = vld [vmem:[#allocation2] sm:$0xe] }
  0x33   : > { %v2695_v22 = vcombine.low %v559_v34, %v573_v15  ;;  %v587_v43 = vsel %vm3633_vm8, %v582_v10, %v586_v4  ;;  %v596_v23 = vrot.slane %v595_v11, 4  ;;  %483 = vst [vmem:[#allocation2 + $0x20] sm:$0xf] %v482_v31  ;;  %v485_v36 = vsel %vm3607_vm5, %v407_v20, %v484_v21  ;;  %v3711_v11 = vld [vmem:[#allocation2 + $0x8] sm:$0xe]  ;;  %v3387_v27 = vld [vmem:[%s4200_s3 + $0x98] sm:$0xff]  }
  0x34   : > { %3192 = vmatpush3.bf16.msra.mxu1 %v3377_v57  ;;  %v411_v39 = vrot.slane %v409_v29, 7  ;;  %v417_v42 = vshrl.u32 %v2956_v32, 16  ;;  %v420_v44 = vshll.u32 %v2956_v32, 16  ;;  %486 = vst [vmem:[#allocation2 + $0x24] sm:$0x1] %v485_v36  ;;  %v425_v45 = vshrl.u32 %v2957_v35, 16 }
  0x35   : > { %3133 = vmatprep.mubr.bf16.mxu0 %v2695_v22  ;;  %3193 = vmatprep.subr.bf16.mxu1 %v3379_v2  ;;  %v601_v34 = vsel %vm3633_vm8, %v596_v23, %v600_v7  ;;  %v428_v46 = vshll.u32 %v2957_v35, 16  ;;  %v2982_v49 = vunpack.c.h.bf16 %v3639_v26  ;;  %v3383_v57 = vld [vmem:[%s4200_s3 + $0xd8] sm:$0xff]   ;;  %v3382_v26 = vld [vmem:[%s4200_s3 + $0xa8] sm:$0xff]   ;;  %v974_v1 = vrot.slane %v3644_v33, 5  ;;  %v3384_v7 = vld [vmem:[%s4200_s3 + $0xa0] sm:$0xff]  }
  0x36   : > { %v2696_v37 = vcombine.low %v587_v43, %v601_v34  ;;  %v414_v50 = vor.u32 %v412_v30, %v411_v39  ;;  %v415_v52 = vrot.slane %v411_v39, 4  ;;  %v419_v54 = vrot.slane %v417_v42, 7  ;;  %v3722_v23 = vld [vmem:[#allocation2 + $0x10] sm:$0xe]  ;;  %v3388_v29 = vld [vmem:[%s4200_s3 + $0xc8] sm:$0xff]  }
  0x37   : > { %v427_v60 = vrot.slane %v425_v45, 7  ;;  %v321_v6 = vmul.f32 %v2982_v49, %v3548_v12  ;;  %v978_v19 = vrot.slane %v3652_v40, 5  ;;  %v982_v21 = vrot.slane %v3661_v59, 5  ;;  %v3733_v34 = vld [vmem:[#allocation2 + $0x18] sm:$0xe] }
  0x38   : > { %3134 = vmatmul.mubr.bf16.vlgmr.msra.gmra.mxu0 %v2696_v37  ;;  %3194 = vmatpush3.bf16.msra.mxu1 %v3379_v2  ;;  %v488_v62 = vsel %vm3596_vm4, %v414_v50, %v487_v41  ;;  %v422_v63 = vor.u32 %v420_v44, %v419_v54  ;;  %v423_v0 = vrot.slane %v419_v54, 4  ;;  %v3385_v2 = vld [vmem:[%s4200_s3 + $0xd0] sm:$0xff]   ;;  %v2719_v30 = vrot.slane %v3701_v5, 9  ;;  %v3398_v40 = vld [vmem:[%s4200_s3 + $0x138] sm:$0xff]  }
  0x39   : > { %3166 = vmatpush3.bf16.msra.mxu0 %v3603_v55  ;;  %3195 = vmatprep.subr.bf16.mxu1 %v3381_v25  ;;  %v491_v55 = vsel %vm3607_vm5, %v415_v52, %v490_v48  ;;  %489 = vst [vmem:[#allocation2 + $0x28] sm:$0xf] %v488_v62  ;;  %v430_v3 = vor.u32 %v428_v46, %v427_v60  ;;  %v431_v4 = vrot.slane %v427_v60, 4  ;;  %v2720_v31 = vrot.slane %v3711_v11, 9  ;;  %v3390_v48 = vld [vmem:[%s4200_s3 + $0x90] sm:$0xff]   ;;  %v3391_v62 = vld [vmem:[%s4200_s3 + $0xc0] sm:$0xff]  }
  0x3a   : > { %3167 = vmatprep.subr.bf16.mxu0 %v3380_v38  ;;  %492 = vst [vmem:[#allocation2 + $0x2c] sm:$0x1] %v491_v55  ;;  %v515_v8 = vld [vmem:[#allocation2 + $0x20] sm:$0xf]  ;;  %v494_v9 = vsel %vm3596_vm4, %v422_v63, %v493_v47  ;;  %v497_v10 = vsel %vm3607_vm5, %v423_v0, %v496_v56  ;;  %v2721_v37 = vrot.slane %v3722_v23, 9  ;;  %v2722_v63 = vrot.slane %v3733_v34, 9 }
  0x3b   : > { %v603_v13 = vshrl.u32 %v515_v8, 16  ;;  %v606_v14 = vshll.u32 %v515_v8, 16  ;;  %495 = vst [vmem:[#allocation2 + $0x30] sm:$0xf] %v494_v9  ;;  %v500_v12 = vsel %vm3596_vm4, %v430_v3, %v499_v17  ;;  %v3715_v15 = vld [vmem:[#allocation2 + $0x24] sm:$0x1]  ;;  %v503_v18 = vsel %vm3607_vm5, %v431_v4, %v502_v61 }
  0x3c   : > { %3196 = vmatpush3.bf16.msra.mxu1 %v3381_v25  ;;  %498 = vst [vmem:[#allocation2 + $0x34] sm:$0x1] %v497_v10  ;;  %501 = vst [vmem:[#allocation2 + $0x38] sm:$0xf] %v500_v12  ;;  %v612_v20 = vshll.u32 %v3715_v15, 16  ;;  %v335_v25 = vadd.f32 %v3556_v16, %v321_v6  ;;  %v975_v51 = vsel %vm3756_vm11, %v2720_v31, %v974_v1 }
  0x3d   : > { %3168 = vmatpush3.bf16.msra.mxu0 %v3380_v38  ;;  %3197 = vmatprep.subr.bf16.mxu1 %v3383_v57  ;;  %504 = vst [vmem:[#allocation2 + $0x3c] sm:$0x1] %v503_v18  ;;  %v605_v22 = vrot.slane %v603_v13, 4  ;;  %v608_v43 = vrot.slane %v606_v14, 5  ;;  %v3393_v56 = vld [vmem:[#allocation2 + $0x8] ss:$8 sps:$4 sm:$0xff]  }
  0x3e   : > { %3169 = vmatprep.subr.bf16.mxu0 %v3382_v26  ;;  %v614_v36 = vrot.slane %v612_v20, 5  ;;  %v343_v42 = vmax.f32 %v335_v25, 0.0  ;;  %v3750_v4 = vld [vmem:[#allocation2 + $0x20] sm:$0xe]  ;;  %v3392_v18 = vld [vmem:[%s4200_s3 + $0x88] sm:$0xff]  }
  0x3f   : > { %v609_v32 = vor.u32 %v608_v43, %v605_v22  ;;  %v505_v31 = vld [vmem:[#allocation2 + $0x40] sm:$0xf] }
  0x40   : > { %3198 = vmatpush3.bf16.msra.mxu1 %v3383_v57  ;;  %v516_v16 = vld [vmem:[#allocation2 + $0x28] sm:$0xf]  ;;  %v2958_v22 = vpack.c.bf16 %v343_v42, %v343_v42 }
  0x41   : > { %3170 = vmatpush3.bf16.msra.mxu0 %v3382_v26  ;;  %3199 = vmatprep.subr.bf16.mxu1 %v3385_v2  ;;  %v3735_v35 = vld [vmem:[#allocation2 + $0x2c] sm:$0x1]  ;;  %v617_v38 = vshrl.u32 %v516_v16, 16  ;;  %v620_v39 = vshll.u32 %v516_v16, 16  ;;  %v2709_v41 = vcombine.low %v515_v8, %v516_v16  ;;  %v610_v45 = vrot.slane %v609_v32, 4 }
  0x42   : > { %3171 = vmatprep.subr.bf16.mxu0 %v3384_v7  ;;  %v517_v44 = vld [vmem:[#allocation2 + $0x30] sm:$0xf]  ;;  %v626_v46 = vshll.u32 %v3735_v35, 16  ;;  %v946_v20 = vld [vmem:[#allocation2 + $0x28] sm:$0xe]  ;;  %v986_v16 = vrot.slane %v3715_v15, 5 }
  0x43   : > { %v3739_v47 = vld [vmem:[#allocation2 + $0x34] sm:$0x1]  ;;  %v619_v49 = vrot.slane %v617_v38, 4  ;;  %v622_v50 = vrot.slane %v620_v39, 5  ;;  %3161 = vmatprep.mubr.bf16.mxu1 %v2709_v41  ;;  %v518_v52 = vld [vmem:[#allocation2 + $0x38] sm:$0xf]  ;;  %v615_v13 = vsel %vm3633_vm8, %v610_v45, %v614_v36  ;;  %v971_v39 = vsel %vm3756_vm11, %v2719_v30, %v970_v28 }
  0x44   : > { %3200 = vmatpush3.bf16.msra.mxu1 %v3385_v2  ;;  %v631_v54 = vshrl.u32 %v517_v44, 16  ;;  %v634_v17 = vshll.u32 %v517_v44, 16  ;;  %v645_v57 = vshrl.u32 %v518_v52, 16  ;;  %v648_v60 = vshll.u32 %v518_v52, 16  ;;  %v3744_v26 = vld [vmem:[#allocation2 + $0x3c] sm:$0x1] }
  0x45   : > { %3172 = vmatpush3.bf16.msra.mxu0 %v3384_v7  ;;  %3201 = vmatprep.subr.bf16.mxu1 %v3388_v29  ;;  %v2710_v61 = vcombine.low %v517_v44, %v518_v52  ;;  %v623_v2 = vor.u32 %v622_v50, %v619_v49  ;;  %v628_v3 = vrot.slane %v626_v46, 5  ;;  %v640_v8 = vshll.u32 %v3739_v47, 16  ;;  %v3397_v15 = vld [vmem:[%s4200_s3 + $0x170] sm:$0xff]   ;;  %v3396_v28 = vld [vmem:[%s4200_s3 + $0x80] sm:$0xff]   ;;  %v948_v11 = vld [vmem:[#allocation2 + $0x38] sm:$0xe] }
  0x46   : > { %3173 = vmatprep.subr.bf16.mxu0 %v3387_v27  ;;  %v633_v0 = vrot.slane %v631_v54, 4  ;;  %v636_v55 = vrot.slane %v634_v17, 5  ;;  %v647_v6 = vrot.slane %v645_v57, 4  ;;  %v650_v7 = vrot.slane %v648_v60, 5  ;;  %v947_v30 = vld [vmem:[#allocation2 + $0x30] sm:$0xe] }
  0x47   : > { %3162 = vmatmul.mubr.bf16.gmra.mxu1 %v2710_v61  ;;  %v654_v9 = vshll.u32 %v3744_v26, 16  ;;  %v624_v14 = vrot.slane %v623_v2, 4  ;;  %v642_v43 = vrot.slane %v640_v8, 5  ;;  %v2723_v41 = vrot.slane %v3750_v4, 9  ;;  %v3404_v1 = vld [vmem:[#allocation2 + $0x28] ss:$8 sps:$4 sm:$0xff]  }
  0x48   : > { %3202 = vmatpush3.bf16.msra.mxu1 %v3388_v29  ;;  %v637_v12 = vor.u32 %v636_v55, %v633_v0  ;;  %v651_v25 = vor.u32 %v650_v7, %v647_v6  ;;  %v3395_v29 = vld [vmem:[#allocation2 + $0x18] ss:$8 sps:$4 sm:$0xff]   ;;  %3205 = vmatprep.mubr.bf16.mxu1 %v3393_v56  ;;  %v2724_v45 = vrot.slane %v946_v20, 9  ;;  %v433_v46 = vshrl.u32 %v2958_v22, 16  ;;  %v3399_v17 = vld [vmem:[%s4200_s3 + $0x168] sm:$0xff]  }
  0x49   : > { %3174 = vmatpush3.bf16.msra.mxu0 %v3387_v27  ;;  %v656_v32 = vrot.slane %v654_v9, 5  ;;  %3203 = vmatprep.subr.bf16.mxu1 %v3391_v62  ;;  %v3394_v27 = vld [vmem:[%s4200_s3 + $0x178] sm:$0xff]   ;;  %v629_v36 = vsel %vm3633_vm8, %v624_v14, %v628_v3  ;;  %v436_v49 = vshll.u32 %v2958_v22, 16  ;;  %v2743_v52 = vcombine.low %v971_v39, %v975_v51  ;;  %v1325_v61 = vld [vmem:[#allocation2 + $0xc] sm:$0x1] }
  0x4a   : > { %3175 = vmatprep.subr.bf16.mxu0 %v3390_v48  ;;  %v638_v38 = vrot.slane %v637_v12, 4  ;;  %v2697_v42 = vcombine.low %v615_v13, %v629_v36  ;;  %v652_v44 = vrot.slane %v651_v25, 4  ;;  %v3795_v54 = vrot.slane %v433_v46, 7  ;;  %v1606_v0 = vld [vmem:[#allocation2 + $0x8] sm:$0xe]  ;;  %v3403_v25 = vld [vmem:[%s4200_s3 + $0x158] sm:$0xff]  }
  0x4b   : > { %v2725_v56 = vrot.slane %v947_v30, 9  ;;  %v983_v60 = vsel %vm3756_vm11, %v2722_v63, %v982_v21  ;;  %v994_v23 = vrot.slane %v3739_v47, 5  ;;  %v998_v59 = vrot.slane %v3744_v26, 5  ;;  %v3400_v26 = vld [vmem:[%s4200_s3 + $0x130] sm:$0xff]   ;;  %v1324_v13 = vld [vmem:[#allocation2 + $0x8] sm:$0xf] }
  0x4c   : > { %v643_v5 = vsel %vm3633_vm8, %v638_v38, %v642_v43  ;;  %3204 = vmatpush3.bf16.msra.mxu1 %v3391_v62  ;;  %3137 = vmatprep.mubr.bf16.mxu0 %v2697_v42  ;;  %v657_v33 = vsel %vm3633_vm8, %v652_v44, %v656_v32  ;;  %v438_v57 = vor.u32 %v436_v49, %v3795_v54  ;;  %v3813_v62 = vld [vmem:[#allocation2 + $0x14] sm:$0x1]  ;;  %v2811_v55 = vrot.slane %v1606_v0, 9  ;;  %v3402_v14 = vld [vmem:[%s4200_s3 + $0x128] sm:$0xff]   ;;  %v1330_v51 = vld [vmem:[#allocation2 + $0x20] sm:$0xf] }
  0x4d   : > { %3176 = vmatpush3.bf16.msra.mxu0 %v3390_v48  ;;  %v2698_v50 = vcombine.low %v643_v5, %v657_v33  ;;  %3237 = vmatprep.subr.bf16.mxu1 %v3394_v27  ;;  %v990_v48 = vrot.slane %v3735_v35, 5  ;;  %v979_v35 = vsel %vm3756_vm11, %v2721_v37, %v978_v19  ;;  %v2726_v19 = vrot.slane %v948_v11, 9  ;;  %v1607_v37 = vld [vmem:[#allocation2 + $0x10] sm:$0xe]  ;;  %v3406_v5 = vld [vmem:[%s4200_s3 + $0x120] sm:$0xff]  }
  0x4e   : > { %3177 = vmatprep.subr.bf16.mxu0 %v3392_v18  ;;  %v506_v34 = vsel %vm3596_vm4, %v438_v57, %v505_v31  ;;  %v987_v21 = vsel %vm3756_vm11, %v2723_v41, %v986_v16  ;;  %v1632_v2 = vrot.slane %v1325_v61, 5  ;;  %v2744_v3 = vcombine.low %v979_v35, %v983_v60  ;;  %v1328_v16 = vld [vmem:[#allocation2 + $0x18] sm:$0xf]  ;;  %v3853_v30 = vld [vmem:[#allocation2 + $0x24] sm:$0x1] }
  0x4f   : > { %3206 = vmatmul.mubr.bf16.vlgmr.msra.gmra.mxu1 %v3395_v29  ;;  %3138 = vmatmul.mubr.bf16.gmra.mxu0 %v2698_v50  ;;  %v991_v63 = vsel %vm3756_vm11, %v2724_v45, %v990_v48  ;;  %507 = vst [vmem:[#allocation2 + $0x40] sm:$0xf] %v506_v34  ;;  %v2812_v47 = vrot.slane %v1607_v37, 9  ;;  %v1636_v4 = vrot.slane %v3813_v62, 5  ;;  %v995_v7 = vsel %vm3756_vm11, %v2725_v56, %v994_v23  ;;  %v3858_v31 = vld [vmem:[#allocation2 + $0x18] sm:$0xe] }
  0x50   : > { %3238 = vmatpush3.bf16.msra.mxu1 %v3394_v27  ;;  %3181 = vmatprep.mubr.bf16.mxu0 %v2743_v52  ;;  %v2745_v6 = vcombine.low %v987_v21, %v991_v63  ;;  %v999_v8 = vsel %vm3756_vm11, %v2726_v19, %v998_v59  ;;  %v1633_v9 = vsel %vm3756_vm11, %v2811_v55, %v1632_v2  ;;  %v1341_v20 = vshrl.u32 %v1324_v13, 16  ;;  %v1332_v63 = vld [vmem:[#allocation2 + $0x28] sm:$0xf]  ;;  %v3873_v55 = vld [vmem:[#allocation2 + $0x2c] sm:$0x1] }
  0x51   : > { %3178 = vmatpush3.bf16.msra.mxu0 %v3392_v18  ;;  %3239 = vmatprep.subr.bf16.mxu1 %v3397_v15  ;;  %v1637_v12 = vsel %vm3756_vm11, %v2812_v47, %v1636_v4  ;;  %v1326_v18 = vld [vmem:[#allocation2 + $0x10] sm:$0xf]  ;;  %v1344_v22 = vshll.u32 %v1324_v13, 16  ;;  %v1350_v43 = vshll.u32 %v1325_v61, 16  ;;  %v1364_v29 = vshll.u32 %v3813_v62, 16  ;;  %v3409_v61 = vld [vmem:[%s4200_s3 + $0x148] sm:$0xff]  }
  0x52   : > { %3179 = vmatprep.subr.bf16.mxu0 %v3396_v28  ;;  %3209 = vmatprep.mubr.bf16.mxu1 %v3404_v1  ;;  %v1355_v32 = vshrl.u32 %v1326_v18, 16  ;;  %v1358_v27 = vshll.u32 %v1326_v18, 16  ;;  %v2746_v36 = vcombine.low %v995_v7, %v999_v8  ;;  %v1343_v39 = vrot.slane %v1341_v20, 4  ;;  %v3407_v1 = vld [vmem:[%s4200_s3 + $0x150] sm:$0xff]   ;;  %v1609_v62 = vld [vmem:[#allocation2 + $0x20] sm:$0xe] }
  0x53   : > { %v1346_v41 = vrot.slane %v1344_v22, 5  ;;  %v2835_v42 = vcombine.low %v1633_v9, %v1637_v12  ;;  %v1369_v45 = vshrl.u32 %v1328_v16, 16  ;;  %v1352_v49 = vrot.slane %v1350_v43, 5  ;;  %v1334_v47 = vld [vmem:[#allocation2 + $0x30] sm:$0xf]  ;;  %v3411_v43 = vld [vmem:[%s4200_s3 + $0x140] sm:$0xff]  }
  0x54   : > { %3240 = vmatpush3.bf16.msra.mxu1 %v3397_v15  ;;  %v1357_v44 = vrot.slane %v1355_v32, 4  ;;  %v1360_v15 = vrot.slane %v1358_v27, 5  ;;  %v1372_v33 = vshll.u32 %v1328_v16, 16  ;;  %v1383_v11 = vshrl.u32 %v1330_v51, 16  ;;  %v3876_v4 = vld [vmem:[#allocation2 + $0x34] sm:$0x1] }
  0x55   : > { %3180 = vmatpush3.bf16.msra.mxu0 %v3396_v28  ;;  %3241 = vmatprep.subr.bf16.mxu1 %v3399_v17  ;;  %v3851_v28 = vld [vmem:[#allocation2 + $0x1c] sm:$0x1]  ;;  %v1347_v46 = vor.u32 %v1346_v41, %v1343_v39  ;;  %v1366_v52 = vrot.slane %v1364_v29, 5  ;;  %v1371_v48 = vrot.slane %v1369_v45, 4  ;;  %v439_v56 = vrot.slane %v3795_v54, 4  ;;  %v3410_v22 = vld [vmem:[%s4200_s3 + $0x110] sm:$0xff]  }
  0x56   : > { %3213 = vmatprep.subr.bf16.mxu0 %v3398_v40  ;;  %v3405_v38 = vld [vmem:[#allocation2 + $0x38] ss:$8 sps:$4 sm:$0xff]   ;;  %v1361_v50 = vor.u32 %v1360_v15, %v1357_v44  ;;  %v1374_v35 = vrot.slane %v1372_v33, 5  ;;  %v1385_v60 = vrot.slane %v1383_v11, 4  ;;  %v1392_v19 = vshll.u32 %v3853_v30, 16 }
  0x57   : > { %3210 = vmatmul.mubr.bf16.gmra.mxu1 %v3405_v38  ;;  %v1348_v57 = vrot.slane %v1347_v46, 4  ;;  %v3408_v54 = vld [vmem:[%s4200_s3 + $0x118] sm:$0xff]   ;;  %v2813_v2 = vrot.slane %v3858_v31, 9  ;;  %v1400_v7 = vshll.u32 %v1332_v63, 16  ;;  %v1411_v8 = vshrl.u32 %v1334_v47, 16  ;;  %v3412_v31 = vld [vmem:[%s4200_s3 + $0x108] sm:$0xff]  }
  0x58   : > { %3182 = vmatmul.mubr.bf16.vlgmr.msra.gmra.mxu0 %v2744_v3  ;;  %3242 = vmatpush3.bf16.msra.mxu1 %v3399_v17  ;;  %v1386_v17 = vshll.u32 %v1330_v51, 16  ;;  %v1362_v0 = vrot.slane %v1361_v50, 4  ;;  %v1375_v37 = vor.u32 %v1374_v35, %v1371_v48  ;;  %v508_v9 = vld [vmem:[#allocation2 + $0x44] sm:$0x1]  ;;  %v2814_v13 = vrot.slane %v1609_v62, 9  ;;  %v3413_v41 = vld [vmem:[%s4200_s3 + $0x1f8] sm:$0xff]  }
  0x59   : > { %3214 = vmatpush3.bf16.msra.mxu0 %v3398_v40  ;;  %3243 = vmatprep.subr.bf16.mxu1 %v3401_v53  ;;  %v1378_v40 = vshll.u32 %v3851_v28, 16  ;;  %v1353_v59 = vsel %vm3633_vm8, %v1348_v57, %v1352_v49  ;;  %v3882_v12 = vrot.slane %v1392_v19, 5  ;;  %v1414_v18 = vshll.u32 %v1334_v47, 16  ;;  %v1336_v20 = vld [vmem:[#allocation2 + $0x38] sm:$0xf]  ;;  %v3415_v35 = vld [vmem:[%s4200_s3 + $0x1f0] sm:$0xff]  }
  0x5a   : > { %3215 = vmatprep.subr.bf16.mxu0 %v3400_v26  ;;  %3185 = vmatprep.mubr.bf16.mxu0 %v2745_v6  ;;  %v1388_v23 = vrot.slane %v1386_v17, 5  ;;  %v1367_v34 = vsel %vm3633_vm8, %v1362_v0, %v1366_v52  ;;  %v1644_v6 = vrot.slane %v3853_v30, 5  ;;  %v1406_v27 = vshll.u32 %v3873_v55, 16  ;;  %v1338_v39 = vld [vmem:[#allocation2 + $0x40] sm:$0xf] }
  0x5b   : > { %3253 = vmatprep.mubr.bf16.mxu1 %v2835_v42  ;;  %v2799_v3 = vcombine.low %v1353_v59, %v1367_v34  ;;  %v1420_v29 = vshll.u32 %v3876_v4, 16  ;;  %v509_v38 = vsel %vm3607_vm5, %v439_v56, %v508_v9  ;;  %v1413_v42 = vrot.slane %v1411_v8, 4  ;;  %v1611_v17 = vld [vmem:[#allocation2 + $0x30] sm:$0xe]  ;;  %v1612_v0 = vld [vmem:[#allocation2 + $0x38] sm:$0xe] }
  0x5c   : > { %3244 = vmatpush3.bf16.msra.mxu1 %v3401_v53  ;;  %v1389_v21 = vor.u32 %v1388_v23, %v1385_v60  ;;  %v1397_v53 = vshrl.u32 %v1332_v63, 16  ;;  %v1416_v44 = vrot.slane %v1414_v18, 5  ;;  %510 = vst [vmem:[#allocation2 + $0x44] sm:$0x1] %v509_v38  ;;  %v1425_v15 = vshrl.u32 %v1336_v20, 16  ;;  %v3414_v23 = vld [vmem:[%s4200_s3 + $0x100] sm:$0xff]  }
  0x5d   : > { %3216 = vmatpush3.bf16.msra.mxu0 %v3400_v26  ;;  %3245 = vmatprep.subr.bf16.mxu1 %v3403_v25  ;;  %v1640_v26 = vrot.slane %v3851_v28, 5  ;;  %v1428_v51 = vshll.u32 %v1336_v20, 16  ;;  %v1337_v28 = vld [vmem:[#allocation2 + $0x3c] sm:$0x1]  ;;  %v1439_v58 = vshrl.u32 %v1338_v39, 16  ;;  %v1442_v30 = vshll.u32 %v1338_v39, 16 }
  0x5e   : > { %3217 = vmatprep.subr.bf16.mxu0 %v3402_v14  ;;  %v3892_v32 = vrot.slane %v1389_v21, 4  ;;  %v1399_v16 = vrot.slane %v1397_v53, 4  ;;  %v3905_v46 = vrot.slane %v1406_v27, 5  ;;  %v3907_v49 = vrot.slane %v1420_v29, 5  ;;  %v1989_v39 = vld [vmem:[#allocation2 + $0x18] sm:$0xf] }
  0x5f   : > { %v1641_v45 = vsel %vm3756_vm11, %v2813_v2, %v1640_v26  ;;  %v1427_v33 = vrot.slane %v1425_v15, 4  ;;  %v1430_v11 = vrot.slane %v1428_v51, 5  ;;  %v1441_v52 = vrot.slane %v1439_v58, 4 }
  0x60   : > { %3186 = vmatmul.mubr.bf16.gmra.mxu0 %v2746_v36  ;;  %3246 = vmatpush3.bf16.msra.mxu1 %v3403_v25  ;;  %v3890_v25 = vrot.slane %v1375_v37, 4  ;;  %v1402_v36 = vrot.slane %v1400_v7, 5  ;;  %v1444_v48 = vrot.slane %v1442_v30, 5  ;;  %v1417_v60 = vor.u32 %v1416_v44, %v1413_v42  ;;  %v3417_v7 = vld [vmem:[%s4200_s3 + $0x1e8] sm:$0xff]  }
  0x61   : > { %3218 = vmatpush3.bf16.msra.mxu0 %v3402_v14  ;;  %3247 = vmatprep.subr.bf16.mxu1 %v3407_v1  ;;  %v3880_v14 = vrot.slane %v1378_v40, 5  ;;  %v2816_v62 = vrot.slane %v1611_v17, 9  ;;  %v1613_v40 = vld [vmem:[#allocation2 + $0x40] sm:$0xe]  ;;  %v1652_v19 = vrot.slane %v3876_v4, 5  ;;  %v1431_v59 = vor.u32 %v1430_v11, %v1427_v33 }
  0x62   : > { %3219 = vmatprep.subr.bf16.mxu0 %v3406_v5  ;;  %3229 = vmatprep.mubr.bf16.mxu0 %v2799_v3  ;;  %v1403_v50 = vor.u32 %v1402_v36, %v1399_v16  ;;  %v1434_v34 = vshll.u32 %v1337_v28, 16  ;;  %v1656_v21 = vrot.slane %v1337_v28, 5  ;;  %v2818_v3 = vrot.slane %v1613_v40, 9  ;;  %v1987_v16 = vld [vmem:[#allocation2 + $0x10] sm:$0xf] }
  0x63   : > { %v1653_v2 = vsel %vm3756_vm11, %v2816_v62, %v1652_v19  ;;  %v1418_v47 = vrot.slane %v1417_v60, 4  ;;  %v1445_v53 = vor.u32 %v1444_v48, %v1441_v52  ;;  %v1395_v18 = vsel %vm3633_vm8, %v3892_v32, %v3882_v12  ;;  %v3951_v36 = vld [vmem:[#allocation2 + $0x14] sm:$0x1]  ;;  %v3965_v17 = vld [vmem:[#allocation2 + $0x24] sm:$0x1] }
  0x64   : > { %3248 = vmatpush3.bf16.msra.mxu1 %v3407_v1  ;;  %v1610_v1 = vld [vmem:[#allocation2 + $0x28] sm:$0xe]  ;;  %v1404_v63 = vrot.slane %v1403_v50, 4  ;;  %v1432_v20 = vrot.slane %v1431_v59, 4  ;;  %v2004_v42 = vshrl.u32 %v1987_v16, 16  ;;  %v2007_v44 = vshll.u32 %v1987_v16, 16 }
  0x65   : > { %3220 = vmatpush3.bf16.msra.mxu0 %v3406_v5  ;;  %3249 = vmatprep.subr.bf16.mxu1 %v3409_v61  ;;  %v1645_v5 = vsel %vm3756_vm11, %v2814_v13, %v1644_v6  ;;  %v2815_v56 = vrot.slane %v1610_v1, 9  ;;  %v3416_v6 = vld [vmem:[%s4200_s3 + $0x1b8] sm:$0xff]   ;;  %v1381_v13 = vsel %vm3633_vm8, %v3890_v25, %v3880_v14  ;;  %v3419_v14 = vld [vmem:[%s4200_s3 + $0x1e0] sm:$0xff]   ;;  %v1423_v25 = vsel %vm3633_vm8, %v1418_v47, %v3907_v49  ;;  %v3418_v28 = vld [vmem:[%s4200_s3 + $0x1b0] sm:$0xff]  }
  0x66   : > { %3221 = vmatprep.subr.bf16.mxu0 %v3408_v54  ;;  %v2836_v57 = vcombine.low %v1641_v45, %v1645_v5  ;;  %v1446_v12 = vrot.slane %v1445_v53, 4  ;;  %v2800_v38 = vcombine.low %v1381_v13, %v1395_v18  ;;  %v2013_v15 = vshll.u32 %v3951_v36, 16  ;;  %v3421_v49 = vld [vmem:[%s4200_s3 + $0x1d8] sm:$0xff]   ;;  %v1991_v1 = vld [vmem:[#allocation2 + $0x20] sm:$0xf]  ;;  %v3425_v13 = vld [vmem:[%s4200_s3 + $0x1c8] sm:$0xff]  }
  0x67   : > { %v2018_v51 = vshrl.u32 %v1989_v39, 16  ;;  %v2021_v45 = vshll.u32 %v1989_v39, 16  ;;  %v2006_v30 = vrot.slane %v2004_v42, 4  ;;  %v3969_v60 = vld [vmem:[#allocation2 + $0x2c] sm:$0x1]  ;;  %v2035_v62 = vshll.u32 %v1991_v1, 16 }
  0x68   : > { %3250 = vmatpush3.bf16.msra.mxu1 %v3409_v61  ;;  %v1648_v61 = vrot.slane %v3873_v55, 5  ;;  %v1339_v55 = vld [vmem:[#allocation2 + $0x44] sm:$0x1]  ;;  %v2015_v52 = vrot.slane %v2013_v15, 5  ;;  %v2041_v47 = vshll.u32 %v3965_v17, 16  ;;  %v2055_v53 = vshll.u32 %v3969_v60, 16 }
  0x69   : > { %3222 = vmatpush3.bf16.msra.mxu0 %v3408_v54  ;;  %3251 = vmatprep.subr.bf16.mxu1 %v3411_v43  ;;  %v2817_v54 = vrot.slane %v1612_v0, 9  ;;  %v1448_v4 = vshll.u32 %v1339_v55, 16  ;;  %v1660_v9 = vrot.slane %v1339_v55, 5  ;;  %v2020_v33 = vrot.slane %v2018_v51, 4  ;;  %v3420_v0 = vld [vmem:[%s4200_s3 + $0x1a8] sm:$0xff]  }
  0x6a   : > { %3223 = vmatprep.subr.bf16.mxu0 %v3410_v22  ;;  %v1649_v37 = vsel %vm3756_vm11, %v2815_v56, %v1648_v61  ;;  %v2023_v11 = vrot.slane %v2021_v45, 5  ;;  %v1993_v56 = vld [vmem:[#allocation2 + $0x28] sm:$0xf]  ;;  %v2032_v61 = vshrl.u32 %v1991_v1, 16  ;;  %v2043_v18 = vrot.slane %v2041_v47, 5 }
  0x6b   : > { %v2837_v26 = vcombine.low %v1649_v37, %v1653_v2  ;;  %v1657_v8 = vsel %vm3756_vm11, %v2817_v54, %v1656_v21  ;;  %v1661_v27 = vsel %vm3756_vm11, %v2818_v3, %v1660_v9  ;;  %v1450_v32 = vrot.slane %v1448_v4, 5  ;;  %v3423_v21 = vld [vmem:[%s4200_s3 + $0x1d0] sm:$0xff]   ;;  %v3422_v4 = vld [vmem:[%s4200_s3 + $0x1a0] sm:$0xff]   ;;  %v3424_v9 = vld [vmem:[%s4200_s3 + $0x198] sm:$0xff]  }
  0x6c   : > { %3252 = vmatpush3.bf16.msra.mxu1 %v3411_v43  ;;  %v1409_v43 = vsel %vm3633_vm8, %v1404_v63, %v3905_v46  ;;  %v2838_v29 = vcombine.low %v1657_v8, %v1661_v27  ;;  %v2009_v46 = vrot.slane %v2007_v44, 5  ;;  %v2049_v19 = vshll.u32 %v1993_v56, 16  ;;  %v3432_v8 = vld [vmem:[#allocation2 + $0x10] ss:$8 sps:$4 sm:$0xff]   ;;  %v3427_v27 = vld [vmem:[%s4200_s3 + $0x1c0] sm:$0xff]  }
  0x6d   : > { %3224 = vmatpush3.bf16.msra.mxu0 %v3410_v22  ;;  %3285 = vmatprep.subr.bf16.mxu1 %v3413_v41  ;;  %v1436_v22 = vrot.slane %v1434_v34, 5  ;;  %v2801_v58 = vcombine.low %v1409_v43, %v1423_v25  ;;  %v2034_v59 = vrot.slane %v2032_v61, 4  ;;  %v2037_v34 = vrot.slane %v2035_v62, 5  ;;  %v3426_v25 = vld [vmem:[%s4200_s3 + $0x190] sm:$0xff]   ;;  %v1999_v44 = vld [vmem:[#allocation2 + $0x40] sm:$0xf] }
  0x6e   : > { %3225 = vmatprep.subr.bf16.mxu0 %v3412_v31  ;;  %v2010_v50 = vor.u32 %v2009_v46, %v2006_v30  ;;  %v2051_v2 = vrot.slane %v2049_v19, 5  ;;  %v3428_v62 = vld [vmem:[%s4200_s3 + $0x188] sm:$0xff]  }
  0x6f   : > { %3254 = vmatmul.mubr.bf16.vlgmr.msra.gmra.mxu1 %v2836_v57  ;;  %v1451_v57 = vsel %vm3633_vm8, %v1446_v12, %v1450_v32  ;;  %v3998_v12 = vld [vmem:[#allocation2 + $0x34] sm:$0x1]  ;;  %v1997_v32 = vld [vmem:[#allocation2 + $0x38] sm:$0xf] }
  0x70   : > { %3286 = vmatpush3.bf16.msra.mxu1 %v3413_v41  ;;  %3257 = vmatprep.mubr.bf16.mxu1 %v2837_v26  ;;  %v3953_v41 = vld [vmem:[#allocation2 + $0x1c] sm:$0x1]  ;;  %v2011_v40 = vrot.slane %v2010_v50, 4  ;;  %v2069_v39 = vshll.u32 %v3998_v12, 16  ;;  %v2074_v42 = vshrl.u32 %v1997_v32, 16  ;;  %v2077_v45 = vshll.u32 %v1997_v32, 16 }
  0x71   : > { %3226 = vmatpush3.bf16.msra.mxu0 %v3412_v31  ;;  %3287 = vmatprep.subr.bf16.mxu1 %v3415_v35  ;;  %v2027_v5 = vshll.u32 %v3953_v41, 16  ;;  %v1437_v31 = vsel %vm3633_vm8, %v1432_v20, %v1436_v22  ;;  %v2057_v20 = vrot.slane %v2055_v53, 5  ;;  %v2088_v50 = vshrl.u32 %v1999_v44, 16  ;;  %v2269_v32 = vld [vmem:[#allocation2 + $0x10] sm:$0xe] }
  0x72   : > { %3227 = vmatprep.subr.bf16.mxu0 %v3414_v23  ;;  %v2802_v37 = vcombine.low %v1437_v31, %v1451_v57  ;;  %v2016_v63 = vsel %vm3633_vm8, %v2011_v40, %v2015_v52  ;;  %v2079_v1 = vrot.slane %v2077_v45, 5  ;;  %v2091_v52 = vshll.u32 %v1999_v44, 16 }
  0x73   : > { %v2029_v48 = vrot.slane %v2027_v5, 5  ;;  %v2090_v40 = vrot.slane %v2088_v50, 4  ;;  %v2903_v44 = vrot.slane %v2269_v32, 9 }
  0x74   : > { %3288 = vmatpush3.bf16.msra.mxu1 %v3415_v35  ;;  %v2024_v35 = vor.u32 %v2023_v11, %v2020_v33  ;;  %v2076_v33 = vrot.slane %v2074_v42, 4  ;;  %v4010_v11 = vld [vmem:[#allocation2 + $0x4c] sm:$0x1]  ;;  %v3436_v42 = vld [vmem:[#allocation2 + $0x30] ss:$8 sps:$4 sm:$0xff]  }
  0x75   : > { %3228 = vmatpush3.bf16.msra.mxu0 %v3414_v23  ;;  %3289 = vmatprep.subr.bf16.mxu1 %v3417_v7  ;;  %v2046_v23 = vshrl.u32 %v1993_v56, 16  ;;  %v2111_v19 = vshll.u32 %v4010_v11, 16 }
  0x76   : > { %3261 = vmatprep.subr.bf16.mxu0 %v3416_v6  ;;  %v2025_v54 = vrot.slane %v2024_v35, 4 }
  0x77   : > { %3258 = vmatmul.mubr.bf16.gmra.mxu1 %v2838_v29  ;;  %v2048_v55 = vrot.slane %v2046_v23, 4  ;;  %v4000_v29 = vld [vmem:[#allocation2 + $0x3c] sm:$0x1]  ;;  %v2093_v23 = vrot.slane %v2091_v52, 5  ;;  %v2113_v53 = vrot.slane %v2111_v19, 5  ;;  %v2323_v52 = vrot.slane %v4010_v11, 5 }
  0x78   : > { %3230 = vmatmul.mubr.bf16.vlgmr.msra.gmra.mxu0 %v2800_v38  ;;  %3290 = vmatpush3.bf16.msra.mxu1 %v3417_v7  ;;  %v2030_v3 = vsel %vm3633_vm8, %v2025_v54, %v2029_v48  ;;  %v2083_v5 = vshll.u32 %v4000_v29, 16  ;;  %v4015_v48 = vld [vmem:[%s4200_s3 + $0x238] sm:$0xff]   ;;  %v2272_v11 = vld [vmem:[#allocation2 + $0x28] sm:$0xe]  ;;  %v2307_v19 = vrot.slane %v3969_v60, 5 }
  0x79   : > { %3262 = vmatpush3.bf16.msra.mxu0 %v3416_v6  ;;  %3291 = vmatprep.subr.bf16.mxu1 %v3419_v14  ;;  %v2891_v26 = vcombine.low %v2016_v63, %v2030_v3  ;;  %v2038_v6 = vor.u32 %v2037_v34, %v2034_v59  ;;  %v2052_v7 = vor.u32 %v2051_v2, %v2048_v55  ;;  %v3431_v2 = vld [vmem:[%s4200_s3 + $0x230] sm:$0xff]  }
  0x7a   : > { %3263 = vmatprep.subr.bf16.mxu0 %v3418_v28  ;;  %3233 = vmatprep.mubr.bf16.mxu0 %v2801_v58  ;;  %v2001_v58 = vld [vmem:[#allocation2 + $0x48] sm:$0xf]  ;;  %v2085_v31 = vrot.slane %v2083_v5, 5  ;;  %v2094_v63 = vor.u32 %v2093_v23, %v2090_v40  ;;  %v2299_v5 = vrot.slane %v3953_v41, 5  ;;  %v2303_v40 = vrot.slane %v3965_v17, 5 }
  0x7b   : > { %3301 = vmatprep.mubr.bf16.mxu1 %v2891_v26  ;;  %v2039_v22 = vrot.slane %v2038_v6, 4  ;;  %v2053_v43 = vrot.slane %v2052_v7, 4  ;;  %v2102_v35 = vshrl.u32 %v2001_v58, 16  ;;  %v2105_v61 = vshll.u32 %v2001_v58, 16  ;;  %v3430_v26 = vld [vmem:[%s4200_s3 + $0x180] sm:$0xff]   ;;  %v3438_v58 = vld [vmem:[%s4200_s3 + $0x218] sm:$0xff]  }
  0x7c   : > { %3292 = vmatpush3.bf16.msra.mxu1 %v3419_v14  ;;  %v1995_v14 = vld [vmem:[#allocation2 + $0x30] sm:$0xf]  ;;  %v2095_v7 = vrot.slane %v2094_v63, 4  ;;  %v3437_v41 = vld [vmem:[#allocation2 + $0x40] ss:$8 sps:$4 sm:$0xff]   ;;  %v2906_v23 = vrot.slane %v2272_v11, 9 }
  0x7d   : > { %3264 = vmatpush3.bf16.msra.mxu0 %v3418_v28  ;;  %3293 = vmatprep.subr.bf16.mxu1 %v3421_v49  ;;  %v2060_v16 = vshrl.u32 %v1995_v14, 16  ;;  %v2063_v38 = vshll.u32 %v1995_v14, 16  ;;  %v2044_v15 = vsel %vm3633_vm8, %v2039_v22, %v2043_v18  ;;  %v2058_v51 = vsel %vm3633_vm8, %v2053_v43, %v2057_v20  ;;  %v4008_v28 = vld [vmem:[#allocation2 + $0x44] sm:$0x1]  ;;  %v3434_v14 = vld [vmem:[%s4200_s3 + $0x228] sm:$0xff]  }
  0x7e   : > { %3265 = vmatprep.subr.bf16.mxu0 %v3420_v0  ;;  %v2097_v57 = vshll.u32 %v4008_v28, 16  ;;  %v2892_v54 = vcombine.low %v2044_v15, %v2058_v51  ;;  %v2104_v34 = vrot.slane %v2102_v35, 4  ;;  %v2311_v18 = vrot.slane %v3998_v12, 5 }
  0x7f   : > { %v2062_v30 = vrot.slane %v2060_v16, 4  ;;  %v2065_v46 = vrot.slane %v2063_v38, 5  ;;  %v3433_v16 = vld [vmem:[#allocation2 + $0x20] ss:$8 sps:$4 sm:$0xff]   ;;  %v2295_v51 = vrot.slane %v3951_v36, 5  ;;  %v2319_v50 = vrot.slane %v4008_v28, 5 }
  0x80   : > { %3234 = vmatmul.mubr.bf16.gmra.mxu0 %v2802_v37  ;;  %3294 = vmatpush3.bf16.msra.mxu1 %v3421_v49  ;;  %v2071_v49 = vrot.slane %v2069_v39, 5  ;;  %v2107_v37 = vrot.slane %v2105_v61, 5  ;;  %v2099_v55 = vrot.slane %v2097_v57, 5  ;;  %v2270_v39 = vld [vmem:[#allocation2 + $0x18] sm:$0xe]  ;;  %v3441_v57 = vld [vmem:[%s4200_s3 + $0x200] sm:$0xff]  }
  0x81   : > { %3266 = vmatpush3.bf16.msra.mxu0 %v3420_v0  ;;  %3295 = vmatprep.subr.bf16.mxu1 %v3423_v21  ;;  %v2066_v56 = vor.u32 %v2065_v46, %v2062_v30  ;;  %v2080_v0 = vor.u32 %v2079_v1, %v2076_v33  ;;  %v2904_v45 = vrot.slane %v2270_v39, 9  ;;  %v2296_v30 = vsel %vm3756_vm11, %v2903_v44, %v2295_v51  ;;  %v3439_v46 = vld [vmem:[%s4200_s3 + $0x210] sm:$0xff]   ;;  %v3440_v33 = vld [vmem:[%s4200_s3 + $0x208] sm:$0xff]   ;;  %v2275_v1 = vld [vmem:[#allocation2 + $0x40] sm:$0xe] }
  0x82   : > { %3267 = vmatprep.subr.bf16.mxu0 %v3422_v4  ;;  %3277 = vmatprep.mubr.bf16.mxu0 %v3432_v8  ;;  %v2108_v47 = vor.u32 %v2107_v37, %v2104_v34  ;;  %v2274_v8 = vld [vmem:[#allocation2 + $0x38] sm:$0xe]  ;;  %v2100_v20 = vsel %vm3633_vm8, %v2095_v7, %v2099_v55  ;;  %v2271_v28 = vld [vmem:[#allocation2 + $0x20] sm:$0xe] }
  0x83   : > { %v2067_v59 = vrot.slane %v2066_v56, 4  ;;  %v2908_v43 = vrot.slane %v2274_v8, 9  ;;  %v2300_v36 = vsel %vm3756_vm11, %v2904_v45, %v2299_v5 }
  0x84   : > { %3296 = vmatpush3.bf16.msra.mxu1 %v3423_v21  ;;  %v2081_v21 = vrot.slane %v2080_v0, 4  ;;  %v2905_v0 = vrot.slane %v2271_v28, 9 }
  0x85   : > { %3268 = vmatpush3.bf16.msra.mxu0 %v3422_v4  ;;  %3297 = vmatprep.subr.bf16.mxu1 %v3425_v13  ;;  %v2072_v3 = vsel %vm3633_vm8, %v2067_v59, %v2071_v49  ;;  %v2273_v4 = vld [vmem:[#allocation2 + $0x30] sm:$0xe]  ;;  %v2927_v49 = vcombine.low %v2296_v30, %v2300_v36  ;;  %v2308_v59 = vsel %vm3756_vm11, %v2906_v23, %v2307_v19 }
  0x86   : > { %3269 = vmatprep.subr.bf16.mxu0 %v3424_v9  ;;  %v2086_v6 = vsel %vm3633_vm8, %v2081_v21, %v2085_v31  ;;  %v2907_v22 = vrot.slane %v2273_v4, 9  ;;  %v2276_v31 = vld [vmem:[#allocation2 + $0x48] sm:$0xe] }
  0x87   : > { %v2910_v56 = vrot.slane %v2276_v31, 9 }
  0x88   : > { %3298 = vmatpush3.bf16.msra.mxu1 %v3425_v13  ;;  %v2109_v13 = vrot.slane %v2108_v47, 4  ;;  %v2312_v38 = vsel %vm3756_vm11, %v2907_v22, %v2311_v18 }
  0x89   : > { %3270 = vmatpush3.bf16.msra.mxu0 %v3424_v9  ;;  %3299 = vmatprep.subr.bf16.mxu1 %v3427_v27  ;;  %v2893_v9 = vcombine.low %v2072_v3, %v2086_v6  ;;  %v2324_v61 = vsel %vm3756_vm11, %v2910_v56, %v2323_v52 }
  0x8a   : > { %3271 = vmatprep.subr.bf16.mxu0 %v3426_v25 }
  0x8c   : > { %3300 = vmatpush3.bf16.msra.mxu1 %v3427_v27  ;;  %v2315_v27 = vrot.slane %v4000_v29, 5 }
  0x8d   : > { %3272 = vmatpush3.bf16.msra.mxu0 %v3426_v25  ;;  %3333 = vmatprep.subr.bf16.mxu1 %v4015_v48  ;;  %v2114_v25 = vsel %vm3633_vm8, %v2109_v13, %v2113_v53 }
  0x8e   : > { %3273 = vmatprep.subr.bf16.mxu0 %v3428_v62  ;;  %v2894_v12 = vcombine.low %v2100_v20, %v2114_v25  ;;  %v2316_v29 = vsel %vm3756_vm11, %v2908_v43, %v2315_v27 }
  0x8f   : > { %3302 = vmatmul.mubr.bf16.vlgmr.msra.gmra.mxu1 %v2892_v54  ;;  %v2929_v15 = vcombine.low %v2312_v38, %v2316_v29  ;;  %v2304_v54 = vsel %vm3756_vm11, %v2905_v0, %v2303_v40 }
  0x90   : > { %3341 = vmatpush3.bf16.msra.mxu1 %v4015_v48  ;;  %3305 = vmatprep.mubr.bf16.mxu1 %v2893_v9  ;;  %v2928_v34 = vcombine.low %v2304_v54, %v2308_v59 }
  0x91   : > { %3274 = vmatpush3.bf16.msra.mxu0 %v3428_v62  ;;  %3334 = vmatprep.subr.bf16.mxu1 %v3431_v2 }
  0x92   : > { %3275 = vmatprep.subr.bf16.mxu0 %v3430_v26 }
  0x94   : > { %3342 = vmatpush3.bf16.msra.mxu1 %v3431_v2 }
  0x95   : > { %3276 = vmatpush3.bf16.msra.mxu0 %v3430_v26  ;;  %3335 = vmatprep.subr.bf16.mxu1 %v3434_v14 }
  0x96   : > { %3309 = vmatprep.subr.bf16.mxu0 %v4015_v48 }
  0x97   : > { %3306 = vmatmul.mubr.bf16.gmra.mxu1 %v2894_v12 }
  0x98   : > { %3278 = vmatmul.mubr.bf16.vlgmr.msra.gmra.mxu0 %v3433_v16  ;;  %3343 = vmatpush3.bf16.msra.mxu1 %v3434_v14 }
  0x99   : > { %3310 = vmatpush3.bf16.msra.mxu0 %v4015_v48  ;;  %3336 = vmatprep.subr.bf16.mxu1 %v3435_v24  ;;  %v2909_v48 = vrot.slane %v2275_v1, 9 }
  0x9a   : > { %3311 = vmatprep.subr.bf16.mxu0 %v3431_v2  ;;  %3281 = vmatprep.mubr.bf16.mxu0 %v3436_v42 }
  0x9b   : > { %3329 = vmatprep.mubr.bf16.mxu1 %v2929_v15  ;;  %v2320_v35 = vsel %vm3756_vm11, %v2909_v48, %v2319_v50 }
  0x9c   : > { %3344 = vmatpush3.bf16.msra.mxu1 %v3435_v24  ;;  %v2930_v62 = vcombine.low %v2320_v35, %v2324_v61 }
  0x9d   : > { %3312 = vmatpush3.bf16.msra.mxu0 %v3431_v2  ;;  %3337 = vmatprep.subr.bf16.mxu1 %v3438_v58 }
  0x9e   : > { %3313 = vmatprep.subr.bf16.mxu0 %v3434_v14 }
  0xa0   : > { %3282 = vmatmul.mubr.bf16.gmra.mxu0 %v3437_v41  ;;  %3345 = vmatpush3.bf16.msra.mxu1 %v3438_v58 }
  0xa1   : > { %3314 = vmatpush3.bf16.msra.mxu0 %v3434_v14  ;;  %3338 = vmatprep.subr.bf16.mxu1 %v3439_v46 }
  0xa2   : > { %3315 = vmatprep.subr.bf16.mxu0 %v3435_v24  ;;  %3325 = vmatprep.mubr.bf16.mxu0 %v2927_v49 }
  0xa4   : > { %3346 = vmatpush3.bf16.msra.mxu1 %v3439_v46 }
  0xa5   : > { %3316 = vmatpush3.bf16.msra.mxu0 %v3435_v24  ;;  %3339 = vmatprep.subr.bf16.mxu1 %v3440_v33 }
  0xa6   : > { %3317 = vmatprep.subr.bf16.mxu0 %v3438_v58 }
  0xa8   : > { %3347 = vmatpush3.bf16.msra.mxu1 %v3440_v33 }
  0xa9   : > { %3318 = vmatpush3.bf16.msra.mxu0 %v3438_v58  ;;  %3340 = vmatprep.subr.bf16.mxu1 %v3441_v57 }
  0xaa   : > { %3319 = vmatprep.subr.bf16.mxu0 %v3439_v46 }
  0xac   : > { %3348 = vmatpush3.bf16.msra.mxu1 %v3441_v57 }
  0xad   : > { %3320 = vmatpush3.bf16.msra.mxu0 %v3439_v46 }
  0xae   : > { %3321 = vmatprep.subr.bf16.mxu0 %v3440_v33 }
  0xaf   : > { %3330 = vmatmul.mubr.bf16.vlgmr.msra.gmra.mxu1 %v2930_v62 }
  0xb1   : > { %3322 = vmatpush3.bf16.msra.mxu0 %v3440_v33 }
  0xb2   : > { %3323 = vmatprep.subr.bf16.mxu0 %v3441_v57 }
  0xb5   : > { %3324 = vmatpush3.bf16.msra.mxu0 %v3441_v57 }
  0xb8   : > { %3326 = vmatmul.mubr.bf16.vlgmr.msra.gmra.mxu0 %v2928_v34 }
  0xef   : > { %v4082_v37 = vpop.f32.mrf.mxu1 }
  0xf1   : > { %v4084_v21 = vpop.f32.mrf.mxu1 }
  0xf3   : > { %v4086_v17 = vpop.f32.mrf.mxu1 }
  0xf5   : > { %v4090_v63 = vpop.f32.mrf.mxu1 }
  0xf8   : > { %v4088_v60 = vpop.f32.mrf.mxu0 }
  0xfa   : > { %v4092_v55 = vpop.f32.mrf.mxu0 }
  0xfc   : > { %v4094_v3 = vpop.f32.mrf.mxu0 }
  0xfe   : > { %v4096_v47 = vpop.f32.mrf.mxu0 }
 0x107   : > { %v3163_v2 = vpop.f32.mrf.mxu1 }
 0x109   : > { %v926_v10 = vpop.f32.mrf.mxu1 }
 0x10b   : > { %v3164_v53 = vpop.f32.mrf.mxu1 }
 0x10d   : > { %v929_v6 = vpop.f32.mrf.mxu1 }
 0x10f   : > { %v3139_v4 = vpop.f32.mrf.mxu0  ;;  %v4098_v7 = vpop.f32.mrf.mxu1 }
 0x110   : > { %v935_v62 = vadd.f32 %v3163_v2, %v3139_v4  ;;  %v919_v2 = vadd.f32 %v4082_v37, %v4088_v60 }
 0x111   : > { %v789_v26 = vpop.f32.mrf.mxu0  ;;  %v4100_v9 = vpop.f32.mrf.mxu1 }
 0x112   : > { %v927_v19 = vadd.f32 %v926_v10, %v789_v26  ;;  %v922_v10 = vadd.f32 %v4086_v17, %v4094_v3 }
 0x113   : > { %v3140_v8 = vpop.f32.mrf.mxu0  ;;  %v4104_v20 = vpop.f32.mrf.mxu1 }
 0x114   : > { %v938_v0 = vadd.f32 %v3164_v53, %v3140_v8  ;;  %v911_v53 = vadd.f32 %v4084_v21, %v4092_v55 }
 0x115   : > { %v792_v13 = vpop.f32.mrf.mxu0  ;;  %v4108_v43 = vpop.f32.mrf.mxu1 }
 0x116   : > { %v930_v54 = vadd.f32 %v929_v6, %v792_v13  ;;  %v914_v13 = vadd.f32 %v4090_v63, %v4096_v47 }
 0x117   : > { %v3211_v14 = vpop.f32.mrf.mxu1 }
 0x118   : > { %v4102_v18 = vpop.f32.mrf.mxu0 }
 0x119   : > { %v1301_v12 = vpop.f32.mrf.mxu1 }
 0x11a   : > { %v4106_v22 = vpop.f32.mrf.mxu0 }
 0x11b   : > { %v3212_v16 = vpop.f32.mrf.mxu1 }
 0x11c   : > { %v3184_v27 = vpop.f32.mrf.mxu0 }
 0x11d   : > { %v1304_v29 = vpop.f32.mrf.mxu1 }
 0x11e   : > { %v4110_v25 = vpop.f32.mrf.mxu0 }
 0x11f   : > { %v1147_v60 = vadd.f32 %v4110_v25, %v914_v13 }
 0x120   : > { %v3187_v32 = vpop.f32.mrf.mxu0 }
 0x121   : > { %v1152_v59 = vadd.f32 %v3187_v32, %v935_v62  ;;  %v1149_v32 = vadd.f32 %v3184_v27, %v922_v10  ;;  %v1317_v27 = vadd.f32 %v4108_v43, %v1147_v60 }
 0x122   : > { %v1131_v38 = vpop.f32.mrf.mxu0 }
 0x123   : > { %v1319_v63 = vadd.f32 %v4104_v20, %v1149_v32 }
 0x124   : > { %v3188_v24 = vpop.f32.mrf.mxu0 }
 0x125   : > { %v1153_v34 = vadd.f32 %v3188_v24, %v938_v0 }
 0x126   : > { %v1134_v44 = vpop.f32.mrf.mxu0 }
 0x12f   : > { %v4112_v39 = vpop.f32.mrf.mxu1 }
 0x131   : > { %v4114_v42 = vpop.f32.mrf.mxu1 }
 0x132   : > { %4213 = vst [vmem:[#allocation3_spill] sm:$0xff] %v4114_v42 }
 0x133   : > { %v4118_v51 = vpop.f32.mrf.mxu1 }
 0x134   : > { %4214 = vst [vmem:[#allocation4_spill] sm:$0xff] %v4118_v51 }
 0x135   : > { %v4122_v5 = vpop.f32.mrf.mxu1 }
 0x136   : > { %4215 = vst [vmem:[#allocation5_spill] sm:$0xff] %v4122_v5  ;;  %v1322_v5 = vadd.f32 %v3211_v14, %v1152_v59  ;;  %v1148_v14 = vadd.f32 %v4102_v18, %v919_v2 }
 0x137   : > { %v3259_v30 = vpop.f32.mrf.mxu1 }
 0x138   : > { %v4116_v15 = vpop.f32.mrf.mxu0  ;;  %v1318_v24 = vadd.f32 %v4098_v7, %v1148_v14 }
 0x139   : > { %v1793_v41 = vpop.f32.mrf.mxu1  ;;  %v4223_v43 = vld [vmem:[#allocation3_spill] sm:$0xff] }
 0x13a   : > { %v4120_v45 = vpop.f32.mrf.mxu0  ;;  %v1600_v25 = vadd.f32 %v4116_v15, %v1318_v24 }
 0x13b   : > { %v3260_v49 = vpop.f32.mrf.mxu1 }
 0x13c   : > { %v4124_v58 = vpop.f32.mrf.mxu0 }
 0x13d   : > { %v1796_v1 = vpop.f32.mrf.mxu1 }
 0x13e   : > { %v4126_v36 = vpop.f32.mrf.mxu0 }
 0x13f   : > { %v1599_v7 = vadd.f32 %v4126_v36, %v1317_v27 }
 0x140   : > { %v3235_v46 = vpop.f32.mrf.mxu0 }
 0x141   : > { %v1604_v42 = vadd.f32 %v3235_v46, %v1322_v5 }
 0x142   : > { %v1583_v33 = vpop.f32.mrf.mxu0 }
 0x144   : > { %v3236_v50 = vpop.f32.mrf.mxu0 }
 0x146   : > { %v1586_v48 = vpop.f32.mrf.mxu0 }
 0x14f   : > { %v4128_v31 = vpop.f32.mrf.mxu1 }
 0x150   : > { %4216 = vst [vmem:[#allocation6_spill] sm:$0xff] %v4128_v31  ;;  %v1151_v31 = vadd.f32 %v1134_v44, %v930_v54 }
 0x151   : > { %v4130_v52 = vpop.f32.mrf.mxu1 }
 0x152   : > { %4217 = vst [vmem:[#allocation7_spill] sm:$0xff] %v4130_v52  ;;  %v1150_v52 = vadd.f32 %v1131_v38, %v927_v19 }
 0x153   : > { %v4134_v57 = vpop.f32.mrf.mxu1 }
 0x154   : > { %4219 = vst [vmem:[#allocation9_spill] sm:$0xff] %v4134_v57  ;;  %v1320_v51 = vadd.f32 %v1301_v12, %v1150_v52  ;;  %v1146_v12 = vadd.f32 %v4106_v22, %v911_v53 }
 0x155   : > { %v4140_v28 = vpop.f32.mrf.mxu1 }
 0x156   : > { %4222 = vst [vmem:[#allocation12_spill] sm:$0xff] %v4140_v28  ;;  %v1602_v6 = vadd.f32 %v1583_v33, %v1320_v51  ;;  %v1316_v44 = vadd.f32 %v4100_v9, %v1146_v12  ;;  %v1601_v51 = vadd.f32 %v4124_v58, %v1319_v63 }
 0x157   : > { %v3307_v23 = vpop.f32.mrf.mxu1  ;;  %v4229_v54 = vld [vmem:[#allocation6_spill] sm:$0xff] }
 0x158   : > { %v4132_v56 = vpop.f32.mrf.mxu0  ;;  %v1812_v38 = vadd.f32 %v1793_v41, %v1602_v6 }
 0x159   : > { %4218 = vst [vmem:[#allocation8_spill] sm:$0xff] %v4132_v56  ;;  %v2246_v57 = vpop.f32.mrf.mxu1 }
 0x15a   : > { %v4136_v35 = vpop.f32.mrf.mxu0 }
 0x15b   : > { %4220 = vst [vmem:[#allocation10_spill] sm:$0xff] %v4136_v35  ;;  %v1323_v35 = vadd.f32 %v3212_v16, %v1153_v34  ;;  %v3308_v26 = vpop.f32.mrf.mxu1  ;;  %v1814_v16 = vadd.f32 %v3259_v30, %v1604_v42  ;;  %v1598_v42 = vadd.f32 %v4120_v45, %v1316_v44  ;;  %v4230_v34 = vld [vmem:[#allocation7_spill] sm:$0xff]  ;;  %v4231_v53 = vld [vmem:[#allocation9_spill] sm:$0xff] }
 0x15c   : > { %v4138_v61 = vpop.f32.mrf.mxu0 }
 0x15d   : > { %4221 = vst [vmem:[#allocation11_spill] sm:$0xff] %v4138_v61  ;;  %v1321_v61 = vadd.f32 %v1304_v29, %v1151_v31  ;;  %v1605_v28 = vadd.f32 %v3236_v50, %v1323_v35  ;;  %v2249_v55 = vpop.f32.mrf.mxu1  ;;  %v1808_v31 = vadd.f32 %v4223_v43, %v1598_v42  ;;  %v4224_v50 = vld [vmem:[#allocation4_spill] sm:$0xff] }
 0x15e   : > { %v4142_v11 = vpop.f32.mrf.mxu0  ;;  %v1811_v15 = vadd.f32 %v4224_v50, %v1601_v51 }
 0x15f   : > { %v1603_v8 = vadd.f32 %v1586_v48, %v1321_v61  ;;  %v1815_v37 = vadd.f32 %v3260_v49, %v1605_v28  ;;  %v4225_v48 = vld [vmem:[#allocation5_spill] sm:$0xff] }
 0x160   : > { %v3283_v40 = vpop.f32.mrf.mxu0 }
 0x161   : > { %v1813_v17 = vadd.f32 %v1796_v1, %v1603_v8  ;;  %v1985_v3 = vadd.f32 %v3283_v40, %v1814_v16  ;;  %v1810_v1 = vadd.f32 %v4112_v39, %v1600_v25 }
 0x162   : > { %v1964_v56 = vpop.f32.mrf.mxu0  ;;  %v4227_v35 = vld [vmem:[#allocation10_spill] sm:$0xff] }
 0x163   : > { %v1983_v18 = vadd.f32 %v1964_v56, %v1812_v38  ;;  %v2267_v30 = vadd.f32 %v3307_v23, %v1985_v3  ;;  %v1809_v56 = vadd.f32 %v4225_v48, %v1599_v7  ;;  %v1979_v61 = vadd.f32 %v4227_v35, %v1808_v31 }
 0x164   : > { %v3284_v4 = vpop.f32.mrf.mxu0  ;;  %v4228_v28 = vld [vmem:[#allocation11_spill] sm:$0xff] }
 0x165   : > { %v1986_v29 = vadd.f32 %v3284_v4, %v1815_v37  ;;  %v2265_v46 = vadd.f32 %v2246_v57, %v1983_v18  ;;  %v4226_v57 = vld [vmem:[#allocation8_spill] sm:$0xff]  ;;  %v1982_v62 = vadd.f32 %v4228_v28, %v1811_v15  ;;  %v1980_v23 = vadd.f32 %v4142_v11, %v1809_v56 }
 0x166   : > { %v1967_v21 = vpop.f32.mrf.mxu0  ;;  %v1981_v39 = vadd.f32 %v4226_v57, %v1810_v1  ;;  %v2261_v2 = vadd.f32 %v4230_v34, %v1979_v61 }
 0x167   : > { %v1984_v22 = vadd.f32 %v1967_v21, %v1813_v17  ;;  %v2268_v41 = vadd.f32 %v3308_v26, %v1986_v29  ;;  %v2264_v10 = vadd.f32 %v4231_v53, %v1982_v62  ;;  %v4232_v26 = vld [vmem:[#allocation12_spill] sm:$0xff] }
 0x168   : > { %v2263_v59 = vadd.f32 %v4229_v54, %v1981_v39  ;;  %v2262_v6 = vadd.f32 %v4232_v26, %v1980_v23 }
 0x169   : > { %v2266_v20 = vadd.f32 %v2249_v55, %v1984_v22 }
 0x16f   : > { %v3331_v47 = vpop.f32.mrf.mxu1 }
 0x170   : > { %v2477_v49 = vadd.f32 %v3331_v47, %v2267_v30 }
 0x171   : > { %v2456_v5 = vpop.f32.mrf.mxu1 }
 0x172   : > { %v2475_v58 = vadd.f32 %v2456_v5, %v2265_v46  ;;  %v2539_v25 = vmul.f32 %v2477_v49, %v2477_v49 }
 0x173   : > { %v3332_v9 = vpop.f32.mrf.mxu1 }
 0x174   : > { %v2478_v33 = vadd.f32 %v3332_v9, %v2268_v41  ;;  %v2537_v44 = vmul.f32 %v2475_v58, %v2475_v58 }
 0x175   : > { %v2459_v45 = vpop.f32.mrf.mxu1 }
 0x176   : > { %v3001_v36 = vpack.c.bf16 %v2478_v33, %v2477_v49  ;;  %v2476_v52 = vadd.f32 %v2459_v45, %v2266_v20  ;;  %v2540_v5 = vmul.f32 %v2478_v33, %v2478_v33 }
 0x178   : > { %3008 = vst [vmem:[%s4171_s30 + $0x18] sm:$0xff] %v3001_v36   ;;  %v2996_v0 = vpack.c.bf16 %v2476_v52, %v2475_v58  ;;  %v3327_v40 = vpop.f32.mrf.mxu0  ;;  %v2538_v18 = vmul.f32 %v2476_v52, %v2476_v52 }
 0x179   : > { %v2473_v8 = vadd.f32 %v3327_v40, %v2263_v59 }
 0x17a   : > { %3007 = vst [vmem:[%s4171_s30 + $0x10] sm:$0xff] %v2996_v0   ;;  %v2440_v19 = vpop.f32.mrf.mxu0 }
 0x17b   : > { %v2471_v13 = vadd.f32 %v2440_v19, %v2261_v2  ;;  %v2535_v55 = vmul.f32 %v2473_v8, %v2473_v8 }
 0x17c   : > { %v3328_v4 = vpop.f32.mrf.mxu0 }
 0x17d   : > { %v2474_v14 = vadd.f32 %v3328_v4, %v2264_v10  ;;  %v2533_v37 = vmul.f32 %v2471_v13, %v2471_v13 }
 0x17e   : > { %v2443_v12 = vpop.f32.mrf.mxu0 }
 0x17f   : > { %v2991_v32 = vpack.c.bf16 %v2474_v14, %v2473_v8  ;;  %v2472_v16 = vadd.f32 %v2443_v12, %v2262_v6  ;;  %v2536_v3 = vmul.f32 %v2474_v14, %v2474_v14 }
 0x181   : > { %3006 = vst [vmem:[%s4171_s30 + $0x8] sm:$0xff] %v2991_v32   ;;  %v2986_v11 = vpack.c.bf16 %v2472_v16, %v2471_v13  ;;  %v2519_v60 = vadd.f32 %v2472_v16, %v2471_v13  ;;  %v2534_v21 = vmul.f32 %v2472_v16, %v2472_v16 }
 0x183   : > { %2987 = vst [vmem:[%s4171_s30] sm:$0xff] %v2986_v11   ;;  %v2520_v38 = vadd.f32 %v2519_v60, %v2473_v8  ;;  %v2541_v17 = vadd.f32 %v2534_v21, %v2533_v37 }
 0x185   : > { %v2521_v29 = vadd.f32 %v2520_v38, %v2474_v14  ;;  %v2542_v24 = vadd.f32 %v2541_v17, %v2535_v55 }
 0x187   : > { %v2522_v63 = vadd.f32 %v2521_v29, %v2475_v58  ;;  %v2543_v47 = vadd.f32 %v2542_v24, %v2536_v3 }
 0x189   : > { %v2523_v22 = vadd.f32 %v2522_v63, %v2476_v52  ;;  %v2544_v27 = vadd.f32 %v2543_v47, %v2537_v44 }
 0x18b   : > { %v2524_v42 = vadd.f32 %v2523_v22, %v2477_v49  ;;  %v2545_v51 = vadd.f32 %v2544_v27, %v2538_v18 }
 0x18d   : > { %v2525_v30 = vadd.f32 %v2524_v42, %v2478_v33  ;;  %v2546_v41 = vadd.f32 %v2545_v51, %v2539_v25 }
 0x18f   : > { %v2526_v7 = vrot.slane %v2525_v30, 4  ;;  %v2547_v9 = vadd.f32 %v2546_v41, %v2540_v5 }
 0x191   : > { %v2527_v46 = vadd.f32 %v2526_v7, %v2525_v30  ;;  %v2548_v20 = vrot.slane %v2547_v9, 4 }
 0x193   : > { %v2528_v1 = vrot.slane %v2527_v46, 2  ;;  %v2549_v43 = vadd.f32 %v2548_v20, %v2547_v9 }
 0x195   : > { %v2529_v31 = vadd.f32 %v2528_v1, %v2527_v46  ;;  %v2550_v50 = vrot.slane %v2549_v43, 2 }
 0x197   : > { %v2530_v15 = vrot.slane %v2529_v31, 1  ;;  %v2551_v45 = vadd.f32 %v2550_v50, %v2549_v43 }
 0x199   : > { %v2531_v49 = vadd.f32 %v2530_v15, %v2529_v31  ;;  %v2552_v58 = vrot.slane %v2551_v45, 1 }
 0x19b   : > { %2532 = vst [vmem:[%s265_s8] sm:$0x1] %v2531_v49  ;;  %v2553_v33 = vadd.f32 %v2552_v58, %v2551_v45 }
 0x19d   : > { %2554 = vst [vmem:[%s268_s11] sm:$0x1] %v2553_v33 }
 0x19e PF: > { %s17_s21 = sadd.s32 1, %s3448_s21  }
 0x19f   : > { %p14_p4 = scmp.ge.s32.totalorder %s17_s21, 4  }
 0x1a1   :  { %16 = sbr.rel (!%p14_p4) target bundleno = 1 (0x1), region = 100 }

</bundles_post_ra>
